<compile_context>
chip_gen: v5e
topology: v5e:2x2
jax: 0.10.0
libtpu: 0.0.40
codegen_flags: <defaults>
</compile_context>

<pallas_src>
import functools

import numpy as np
import jax
import jax.numpy as jnp
from jax import lax
from jax.experimental import pallas as pl
from jax.experimental.pallas import tpu as pltpu

_EPS = 1e-5
_VMEM_LIMIT = 64 * 1024 * 1024


# --------------------------------------------------------------------------
# small in-kernel / glue helpers
# --------------------------------------------------------------------------
def _partial_stats(y):
    """Per-channel [sum, sum-of-squares] over the lane axis, on the MXU
    (ones-vector matmul) so the XLU slot stays free for the depthwise rolls."""
    ones = jnp.ones((y.shape[-1], 1), jnp.float32)
    s = jnp.dot(y, ones, preferred_element_type=jnp.float32)
    sq = jnp.dot(y * y, ones, preferred_element_type=jnp.float32)
    return jnp.concatenate([s, sq], axis=1)                  # (Ch, 2)


def _finish_bn(partial, gamma, beta, count, eps=_EPS):
    """Combine per-tile partial stats -> per-channel (scale, shift), each (Ch, 1)."""
    tot = partial.reshape(-1, partial.shape[-2], 2).sum(axis=0)      # (Ch, 2)
    mean = tot[:, 0] / count
    var = jnp.maximum(tot[:, 1] / count - mean * mean, 0.0)          # cancellation guard
    s = gamma * lax.rsqrt(var + eps)
    b = beta - mean * s
    return s[:, None], b[:, None]


def _compiler_params(n_axes):
    return pltpu.CompilerParams(
        dimension_semantics=("parallel",) * n_axes,
        vmem_limit_bytes=_VMEM_LIMIT)


# --------------------------------------------------------------------------
# pass 1: grouped 1x1 conv (+shuffle folded into row order) + BN2 partial stats
# --------------------------------------------------------------------------
def _conv1_kernel(x_ref, w1_ref, b1_ref, mid_ref, st_ref):
    x = x_ref[...].astype(jnp.float32)                               # (C, Lt)
    mid = jnp.dot(w1_ref[...], x, preferred_element_type=jnp.float32) + b1_ref[...]
    mid_ref[...] = mid.astype(mid_ref.dtype)
    st_ref[...] = _partial_stats(mid)


def _run_conv1(x3, w1d, b1, lane_tile):
    N, C, HW = x3.shape
    Cbp = w1d.shape[0]
    nL = HW // lane_tile
    cost = pl.CostEstimate(
        flops=2 * N * Cbp * C * HW + 6 * N * Cbp * HW,
        transcendentals=0,
        bytes_accessed=int((x3.size + N * Cbp * HW) * x3.dtype.itemsize
                           + (w1d.size + b1.size) * 4))
    return pl.pallas_call(
        _conv1_kernel,
        grid=(N, nL),
        in_specs=[
            pl.BlockSpec((None, C, lane_tile), lambda n, l: (n, 0, l)),
            pl.BlockSpec((Cbp, C), lambda n, l: (0, 0)),
            pl.BlockSpec((Cbp, 1), lambda n, l: (0, 0)),
        ],
        out_specs=[
            pl.BlockSpec((None, Cbp, lane_tile), lambda n, l: (n, 0, l)),
            pl.BlockSpec((None, None, Cbp, 2), lambda n, l: (n, l, 0, 0)),
        ],
        out_shape=[
            jax.ShapeDtypeStruct((N, Cbp, HW), x3.dtype),
            jax.ShapeDtypeStruct((N, nL, Cbp, 2), jnp.float32),
        ],
        compiler_params=_compiler_params(2),
        cost_estimate=cost,
    )(x3, w1d, b1)


# --------------------------------------------------------------------------
# pass 2: BN2 apply + ReLU + depthwise 3x3 (masked lane-rolls) + BN4 partial stats
# --------------------------------------------------------------------------
def _dwconv_kernel(mid_ref, prm_ref, cm_ref, acc_ref, st_ref, *, H, W):
    HW = H * W
    prm = prm_ref[...]                                               # (Cbp, 3): s2, t2, b3
    r = jnp.maximum(mid_ref[...].astype(jnp.float32) * prm[:, 0:1] + prm[:, 1:2], 0.0)
    acc = cm_ref[4] * r                                              # centre tap
    for dh in (-1, 0, 1):
        for dw in (-1, 0, 1):
            if dh == 0 and dw == 0:
                continue
            d = dh * W + dw
            tap = (dh + 1) * 3 + (dw + 1)
            # cm already holds coef * boundary-mask -> one mul + one add per tap.
            acc = acc + cm_ref[tap] * pltpu.roll(r, shift=(-d) % HW, axis=1)
    acc = acc + prm[:, 2:3]                                          # conv3 bias
    acc_ref[...] = acc.astype(acc_ref.dtype)
    st_ref[...] = _partial_stats(acc)


def _run_dwconv(mid, prm, coefmask, H, W):
    N, Cbp, HW = mid.shape
    cost = pl.CostEstimate(
        flops=(2 * 9 + 8) * N * Cbp * HW,
        transcendentals=0,
        bytes_accessed=int(2 * mid.size * mid.dtype.itemsize + coefmask.size * 4))
    return pl.pallas_call(
        functools.partial(_dwconv_kernel, H=H, W=W),
        grid=(N,),
        in_specs=[
            pl.BlockSpec((None, Cbp, HW), lambda n: (n, 0, 0)),
            pl.BlockSpec((Cbp, 3), lambda n: (0, 0)),
            pl.BlockSpec((9, Cbp, HW), lambda n: (0, 0, 0)),
        ],
        out_specs=[
            pl.BlockSpec((None, Cbp, HW), lambda n: (n, 0, 0)),
            pl.BlockSpec((None, Cbp, 2), lambda n: (n, 0, 0)),
        ],
        out_shape=[
            jax.ShapeDtypeStruct((N, Cbp, HW), mid.dtype),
            jax.ShapeDtypeStruct((N, Cbp, 2), jnp.float32),
        ],
        compiler_params=_compiler_params(1),
        cost_estimate=cost,
    )(mid, prm, coefmask)


# --------------------------------------------------------------------------
# pass 3: conv5 with BN4 folded in -> BN6 partial stats only (no store)
# --------------------------------------------------------------------------
def _conv5_stats_kernel(acc_ref, w5_ref, b5_ref, st_ref):
    acc = acc_ref[...].astype(jnp.float32)                           # (Cbp, Lt)
    out = jnp.dot(w5_ref[...], acc, preferred_element_type=jnp.float32) + b5_ref[...]
    st_ref[...] = _partial_stats(out)


def _run_conv5_stats(acc, w5s, bias5, lane_tile):
    N, Cbp, HW = acc.shape
    C = w5s.shape[0]
    nL = HW // lane_tile
    cost = pl.CostEstimate(
        flops=2 * N * C * Cbp * HW + 6 * N * C * HW,
        transcendentals=0,
        bytes_accessed=int(acc.size * acc.dtype.itemsize + (w5s.size + bias5.size) * 4))
    return pl.pallas_call(
        _conv5_stats_kernel,
        grid=(N, nL),
        in_specs=[
            pl.BlockSpec((None, Cbp, lane_tile), lambda n, l: (n, 0, l)),
            pl.BlockSpec((C, Cbp), lambda n, l: (0, 0)),
            pl.BlockSpec((C, 1), lambda n, l: (0, 0)),
        ],
        out_specs=pl.BlockSpec((None, None, C, 2), lambda n, l: (n, l, 0, 0)),
        out_shape=jax.ShapeDtypeStruct((N, nL, C, 2), jnp.float32),
        compiler_params=_compiler_params(2),
        cost_estimate=cost,
    )(acc, w5s, bias5)


# --------------------------------------------------------------------------
# pass 4: conv5 with BN4 + BN6 folded in + residual + ReLU
# --------------------------------------------------------------------------
def _final_kernel(acc_ref, x_ref, w6_ref, b6_ref, o_ref):
    acc = acc_ref[...].astype(jnp.float32)
    out = jnp.dot(w6_ref[...], acc, preferred_element_type=jnp.float32) + b6_ref[...]
    o_ref[...] = jnp.maximum(x_ref[...].astype(jnp.float32) + out, 0.0).astype(o_ref.dtype)


def _run_final(acc, x3, w6, bias6, lane_tile):
    N, C, HW = x3.shape
    Cbp = acc.shape[1]
    nL = HW // lane_tile
    cost = pl.CostEstimate(
        flops=2 * N * C * Cbp * HW + 4 * N * C * HW,
        transcendentals=0,
        bytes_accessed=int((acc.size + 2 * x3.size) * x3.dtype.itemsize
                           + (w6.size + bias6.size) * 4))
    return pl.pallas_call(
        _final_kernel,
        grid=(N, nL),
        in_specs=[
            pl.BlockSpec((None, Cbp, lane_tile), lambda n, l: (n, 0, l)),
            pl.BlockSpec((None, C, lane_tile), lambda n, l: (n, 0, l)),
            pl.BlockSpec((C, Cbp), lambda n, l: (0, 0)),
            pl.BlockSpec((C, 1), lambda n, l: (0, 0)),
        ],
        out_specs=pl.BlockSpec((None, C, lane_tile), lambda n, l: (n, 0, l)),
        out_shape=jax.ShapeDtypeStruct((N, C, HW), x3.dtype),
        compiler_params=_compiler_params(2),
        cost_estimate=cost,
    )(acc, x3, w6, bias6)


# --------------------------------------------------------------------------
# static weight preparation (numpy; done once per module in a real deployment)
# --------------------------------------------------------------------------
def _group_conv_dense(w, groups):
    """(out_c, in_c//groups, 1, 1) -> dense block-diagonal (out_c, in_c)."""
    out_c, in_per_g = w.shape[0], w.shape[1]
    out_per_g = out_c // groups
    dense = np.zeros((out_c, in_per_g * groups), np.float32)
    for g in range(groups):
        dense[g * out_per_g:(g + 1) * out_per_g,
              g * in_per_g:(g + 1) * in_per_g] = w[g * out_per_g:(g + 1) * out_per_g, :, 0, 0]
    return dense


def _pick_lane_tile(hw, max_lanes=2048):
    """Largest multiple-of-128 divisor of hw (<= max_lanes); else the full axis.
    Keeps output tiles lane-dense (unmasked vector stores) and the matmul lane
    dimension wide enough to keep the MXU fed."""
    best = hw
    for t in range(128, min(hw, max_lanes) + 1, 128):
        if hw % t == 0:
            best = t
    return best


def _prepare_params(p, H, W, groups):
    Cb = int(p['w1'].shape[0])
    Cbp = -(-Cb // 8) * 8            # pad bottleneck channels to a sublane multiple
    HW = H * W
    cpg = Cb // groups
    # channel shuffle folded into conv1 / bn2 row order
    perm = np.array([(j % groups) * cpg + (j // groups) for j in range(Cb)])

    def padc(a):                     # zero-pad channel axis 0 up to Cbp
        return np.pad(a, [(0, Cbp - a.shape[0])] + [(0, 0)] * (a.ndim - 1))

    w1 = np.asarray(p['w1'], np.float32)
    w3 = np.asarray(p['w3'], np.float32)
    w5 = np.asarray(p['w5'], np.float32)

    # depthwise taps * image-boundary masks, (9, Cbp, HW); dwk[3i+j, c] = w3[c,0,i,j]
    lane = np.arange(HW)
    wi, hi = lane % W, lane // W
    dwk = np.pad(w3[:, 0].transpose(1, 2, 0).reshape(9, Cb), ((0, 0), (0, Cbp - Cb)))
    cm = np.zeros((9, Cbp, HW), np.float32)
    for dh in (-1, 0, 1):
        for dw in (-1, 0, 1):
            tap = (dh + 1) * 3 + (dw + 1)
            valid = ((wi + dw >= 0) & (wi + dw < W) &
                     (hi + dh >= 0) & (hi + dh < H)).astype(np.float32)
            cm[tap] = dwk[tap][:, None] * valid[None, :]

    q = dict(
        w1d=jnp.asarray(padc(_group_conv_dense(w1, groups)[perm])),            # (Cbp, C)
        b1=jnp.asarray(padc(np.asarray(p['b1'], np.float32)[perm][:, None])),  # (Cbp, 1)
        g2=jnp.asarray(padc(np.asarray(p['g2'], np.float32)[perm][:, None])[:, 0]),
        bt2=jnp.asarray(padc(np.asarray(p['bt2'], np.float32)[perm][:, None])[:, 0]),
        coefmask=jnp.asarray(cm),                                              # (9, Cbp, HW)
        b3=jnp.asarray(padc(np.asarray(p['b3'], np.float32)[:, None])),        # (Cbp, 1)
        g4=jnp.asarray(padc(np.asarray(p['g4'], np.float32)[:, None])[:, 0]),
        bt4=jnp.asarray(padc(np.asarray(p['bt4'], np.float32)[:, None])[:, 0]),
        w5d=jnp.asarray(np.pad(_group_conv_dense(w5, groups), ((0, 0), (0, Cbp - Cb)))),
        b5=jnp.asarray(np.asarray(p['b5'], np.float32)),
        g6=jnp.asarray(np.asarray(p['g6'], np.float32)),
        bt6=jnp.asarray(np.asarray(p['bt6'], np.float32)),
    )
    return q


# --------------------------------------------------------------------------
# full forward pipeline
# --------------------------------------------------------------------------
@functools.partial(jax.jit, static_argnames=("H", "W", "lane_tile"))
def _pipeline(x3, q, *, H, W, lane_tile):
    N, C, HW = x3.shape
    count = N * HW
    hp = lax.Precision.HIGHEST

    # pass 1: conv1 (+shuffle folded) -> mid, BN2 partial stats
    mid, st1 = _run_conv1(x3, q["w1d"], q["b1"], lane_tile)
    s2, t2 = _finish_bn(st1, q["g2"], q["bt2"], count)
    prm2 = jnp.concatenate([s2, t2, q["b3"]], axis=1)                 # (Cbp, 3)

    # pass 2: BN2+ReLU apply + depthwise 3x3 -> acc, BN4 partial stats
    acc, st2 = _run_dwconv(mid, prm2, q["coefmask"], H, W)
    s4, t4 = _finish_bn(st2, q["g4"], q["bt4"], count)
    # fold BN4 into conv5:  w5 @ (s4*acc + t4) + b5  ==  w5s @ acc + bias5
    w5s = q["w5d"] * s4[:, 0][None, :]
    bias5 = jnp.dot(q["w5d"], t4, precision=hp) + q["b5"][:, None]

    # pass 3: conv5 (BN4 folded) -> BN6 partial stats
    st3 = _run_conv5_stats(acc, w5s, bias5, lane_tile)
    s6, t6 = _finish_bn(st3, q["g6"], q["bt6"], count)
    # fold BN6 on top:  s6*(w5s@acc + bias5) + t6  ==  w6 @ acc + bias6
    w6 = w5s * s6
    bias6 = s6 * bias5 + t6

    # pass 4: conv5 (BN4+BN6 folded) + residual + ReLU
    return _run_final(acc, x3, w6, bias6, lane_tile)


def shufflenet_unit_a(x, p, groups=3):
    """ShuffleNetUnitA (stride=1) forward with training-mode BatchNorm."""
    N, C, H, W = x.shape
    q = _prepare_params(p, H, W, groups)
    HW = H * W
    lane_tile = _pick_lane_tile(HW)
    x3 = x.reshape(N, C, HW)                 # free reshape; keep the caller's dtype
    out3 = _pipeline(x3, q, H=H, W=W, lane_tile=lane_tile)
    return out3.reshape(N, C, H, W)


# --------------------------------------------------------------------------
# pure-JAX reference (identical training-mode BN semantics)
# --------------------------------------------------------------------------
def ref_forward(x, p, groups=3):
    def bn(y, gamma, beta, eps=_EPS):
        mean = y.mean(axis=(0, 2, 3), keepdims=True)
        var = ((y - mean) ** 2).mean(axis=(0, 2, 3), keepdims=True)
        return ((y - mean) / jnp.sqrt(var + eps) * gamma[None, :, None, None]
                + beta[None, :, None, None])

    dn = ('NCHW', 'OIHW', 'NCHW')
    hp = lax.Precision.HIGHEST
    out = lax.conv_general_dilated(x, p['w1'], (1, 1), 'VALID',
                                   feature_group_count=groups,
                                   dimension_numbers=dn, precision=hp)
    out = out + p['b1'][None, :, None, None]
    out = jnp.maximum(bn(out, p['g2'], p['bt2']), 0.0)
    N, Cb, H, W = out.shape
    out = out.reshape(N, groups, Cb // groups, H, W).transpose(0, 2, 1, 3, 4)
    out = out.reshape(N, Cb, H, W)
    out = lax.conv_general_dilated(out, p['w3'], (1, 1), ((1, 1), (1, 1)),
                                   feature_group_count=Cb,
                                   dimension_numbers=dn, precision=hp)
    out = out + p['b3'][None, :, None, None]
    out = bn(out, p['g4'], p['bt4'])
    out = lax.conv_general_dilated(out, p['w5'], (1, 1), 'VALID',
                                   feature_group_count=groups,
                                   dimension_numbers=dn, precision=hp)
    out = out + p['b5'][None, :, None, None]
    out = bn(out, p['g6'], p['bt6'])
    return jnp.maximum(x + out, 0.0)


if __name__ == "__main__":
    N, C, H, W = 2, 24, 16, 16        # in_channels == out_channels, %4==0, %groups==0
    groups = 3
    Cb = C // 4                        # bottleneck channels = 6

    key = jax.random.PRNGKey(0)
    ks = jax.random.split(key, 13)
    params = {
        'w1': 0.2 * jax.random.normal(ks[0], (Cb, C // groups, 1, 1), jnp.float32),
        'b1': 0.1 * jax.random.normal(ks[1], (Cb,), jnp.float32),
        'g2': 1.0 + 0.1 * jax.random.normal(ks[2], (Cb,), jnp.float32),
        'bt2': 0.1 * jax.random.normal(ks[3], (Cb,), jnp.float32),
        'w3': 0.2 * jax.random.normal(ks[4], (Cb, 1, 3, 3), jnp.float32),
        'b3': 0.1 * jax.random.normal(ks[5], (Cb,), jnp.float32),
        'g4': 1.0 + 0.1 * jax.random.normal(ks[6], (Cb,), jnp.float32),
        'bt4': 0.1 * jax.random.normal(ks[7], (Cb,), jnp.float32),
        'w5': 0.2 * jax.random.normal(ks[8], (C, Cb // groups, 1, 1), jnp.float32),
        'b5': 0.1 * jax.random.normal(ks[9], (C,), jnp.float32),
        'g6': 1.0 + 0.1 * jax.random.normal(ks[10], (C,), jnp.float32),
        'bt6': 0.1 * jax.random.normal(ks[11], (C,), jnp.float32),
    }
    x = jax.random.normal(ks[12], (N, C, H, W), jnp.float32)

    out = jax.block_until_ready(shufflenet_unit_a(x, params, groups=groups))
    ref = jax.block_until_ready(ref_forward(x, params, groups=groups))

    assert out.shape == x.shape and out.dtype == x.dtype
    np.testing.assert_allclose(np.asarray(out), np.asarray(ref), rtol=1e-2, atol=1e-2)
    print("KERNEL_OK")
</pallas_src>

<mosaic_0001>
module attributes {stable_mosaic.version = 11 : i64} {
  func.func @_conv1_kernel(%arg0: i32, %arg1: i32, %arg2: memref<1x24x256xf32, #tpu.memory_space<vmem>>, %arg3: memref<8x24xf32, #tpu.memory_space<vmem>>, %arg4: memref<8x1xf32, #tpu.memory_space<vmem>>, %arg5: memref<1x8x256xf32, #tpu.memory_space<vmem>>, %arg6: memref<1x1x8x2xf32, #tpu.memory_space<vmem>>) attributes {dimension_semantics = [#tpu.dimension_semantics<parallel>, #tpu.dimension_semantics<parallel>], iteration_bounds = array<i64: 2, 1>, scalar_prefetch = 0 : i64, scratch_operands = 0 : i64, tpu.core_type = #tpu.core_type<tc>, window_params = [{transform_indices = @transform_0, window_bounds = array<i64: 1, 24, 256>}, {pipeline_mode = #tpu.pipeline_mode<synchronous>, transform_indices = @transform_1, window_bounds = array<i64: 8, 24>}, {pipeline_mode = #tpu.pipeline_mode<synchronous>, transform_indices = @transform_2, window_bounds = array<i64: 8, 1>}, {transform_indices = @transform_3, window_bounds = array<i64: 1, 8, 256>}, {transform_indices = @transform_4, window_bounds = array<i64: 1, 1, 8, 2>}]} {
    %c0 = arith.constant 0 : index
    %c0_0 = arith.constant 0 : index
    %c0_1 = arith.constant 0 : index
    %0 = vector.load %arg2[%c0, %c0_0, %c0_1] : memref<1x24x256xf32, #tpu.memory_space<vmem>>, vector<1x24x256xf32>
    %1 = vector.shape_cast %0 : vector<1x24x256xf32> to vector<24x256xf32>
    %c0_2 = arith.constant 0 : index
    %c0_3 = arith.constant 0 : index
    %2 = vector.load %arg3[%c0_2, %c0_3] : memref<8x24xf32, #tpu.memory_space<vmem>>, vector<8x24xf32>
    %cst = arith.constant dense<0.000000e+00> : vector<8x256xf32>
    %3 = tpu.matmul %2, %1, %cst {dimension_numbers = #tpu.dot_dimension_numbers<[1], [0], [0], [1], [0, 0, 1, 1], [], []>} : vector<8x24xf32>, vector<24x256xf32>, vector<8x256xf32> -> vector<8x256xf32>
    %c0_4 = arith.constant 0 : index
    %c0_5 = arith.constant 0 : index
    %4 = vector.load %arg4[%c0_4, %c0_5] : memref<8x1xf32, #tpu.memory_space<vmem>>, vector<8x1xf32>
    %5 = vector.broadcast %4 : vector<8x1xf32> to vector<8x256xf32>
    %6 = arith.addf %3, %5 : vector<8x256xf32>
    %c0_6 = arith.constant 0 : index
    %c0_7 = arith.constant 0 : index
    %c0_8 = arith.constant 0 : index
    %7 = vector.load %arg5[%c0_6, %c0_7, %c0_8] : memref<1x8x256xf32, #tpu.memory_space<vmem>>, vector<1x8x256xf32>
    %8 = vector.shape_cast %7 : vector<1x8x256xf32> to vector<8x256xf32>
    %9 = vector.shape_cast %6 : vector<8x256xf32> to vector<1x8x256xf32>
    tpu.vector_store %arg5[%c0_6, %c0_7, %c0_8], %9 {strides = array<i32>} : memref<1x8x256xf32, #tpu.memory_space<vmem>>, vector<1x8x256xf32>,
    %cst_9 = arith.constant 1.000000e+00 : f32
    %10 = vector.broadcast %cst_9 : f32 to vector<256x1xf32>
    %cst_10 = arith.constant dense<0.000000e+00> : vector<8x1xf32>
    %11 = tpu.matmul %6, %10, %cst_10 {dimension_numbers = #tpu.dot_dimension_numbers<[1], [0], [0], [1], [0, 0, 1, 1], [], []>} : vector<8x256xf32>, vector<256x1xf32>, vector<8x1xf32> -> vector<8x1xf32>
    %12 = arith.mulf %6, %6 : vector<8x256xf32>
    %cst_11 = arith.constant dense<0.000000e+00> : vector<8x1xf32>
    %13 = tpu.matmul %12, %10, %cst_11 {dimension_numbers = #tpu.dot_dimension_numbers<[1], [0], [0], [1], [0, 0, 1, 1], [], []>} : vector<8x256xf32>, vector<256x1xf32>, vector<8x1xf32> -> vector<8x1xf32>
    %14 = tpu.concatenate %11, %13 in 1 : vector<8x1xf32>, vector<8x1xf32> -> vector<8x2xf32>
    %c0_12 = arith.constant 0 : index
    %c0_13 = arith.constant 0 : index
    %c0_14 = arith.constant 0 : index
    %c0_15 = arith.constant 0 : index
    %15 = vector.load %arg6[%c0_12, %c0_13, %c0_14, %c0_15] : memref<1x1x8x2xf32, #tpu.memory_space<vmem>>, vector<1x1x8x2xf32>
    %16 = vector.shape_cast %15 : vector<1x1x8x2xf32> to vector<8x2xf32>
    %17 = vector.shape_cast %14 : vector<8x2xf32> to vector<1x1x8x2xf32>
    tpu.vector_store %arg6[%c0_12, %c0_13, %c0_14, %c0_15], %17 {strides = array<i32>} : memref<1x1x8x2xf32, #tpu.memory_space<vmem>>, vector<1x1x8x2xf32>,
    return
  }
  func.func @transform_0(%arg0: i32, %arg1: i32) -> (i32, i32, i32) {
    %c0_i32 = arith.constant 0 : i32
    %c0_i32_0 = arith.constant 0 : i32
    return %arg0, %c0_i32, %arg1 : i32, i32, i32
  }
  func.func @transform_1(%arg0: i32, %arg1: i32) -> (i32, i32) {
    %c0_i32 = arith.constant 0 : i32
    %c0_i32_0 = arith.constant 0 : i32
    %c0_i32_1 = arith.constant 0 : i32
    return %c0_i32, %c0_i32_0 : i32, i32
  }
  func.func @transform_2(%arg0: i32, %arg1: i32) -> (i32, i32) {
    %c0_i32 = arith.constant 0 : i32
    %c0_i32_0 = arith.constant 0 : i32
    %c0_i32_1 = arith.constant 0 : i32
    return %c0_i32, %c0_i32_0 : i32, i32
  }
  func.func @transform_3(%arg0: i32, %arg1: i32) -> (i32, i32, i32) {
    %c0_i32 = arith.constant 0 : i32
    %c0_i32_0 = arith.constant 0 : i32
    return %arg0, %c0_i32, %arg1 : i32, i32, i32
  }
  func.func @transform_4(%arg0: i32, %arg1: i32) -> (i32, i32, i32, i32) {
    %c0_i32 = arith.constant 0 : i32
    %c0_i32_0 = arith.constant 0 : i32
    %c0_i32_1 = arith.constant 0 : i32
    return %arg0, %arg1, %c0_i32, %c0_i32_0 : i32, i32, i32, i32
  }
}

module attributes {stable_mosaic.version = 11 : i64} {
  func.func @_dwconv_kernel(%arg0: i32, %arg1: memref<1x8x256xf32, #tpu.memory_space<vmem>>, %arg2: memref<8x3xf32, #tpu.memory_space<vmem>>, %arg3: memref<9x8x256xf32, #tpu.memory_space<vmem>>, %arg4: memref<1x8x256xf32, #tpu.memory_space<vmem>>, %arg5: memref<1x8x2xf32, #tpu.memory_space<vmem>>) attributes {dimension_semantics = [#tpu.dimension_semantics<parallel>], iteration_bounds = array<i64: 2>, scalar_prefetch = 0 : i64, scratch_operands = 0 : i64, tpu.core_type = #tpu.core_type<tc>, window_params = [{transform_indices = @transform_0, window_bounds = array<i64: 1, 8, 256>}, {pipeline_mode = #tpu.pipeline_mode<synchronous>, transform_indices = @transform_1, window_bounds = array<i64: 8, 3>}, {pipeline_mode = #tpu.pipeline_mode<synchronous>, transform_indices = @transform_2, window_bounds = array<i64: 9, 8, 256>}, {transform_indices = @transform_3, window_bounds = array<i64: 1, 8, 256>}, {transform_indices = @transform_4, window_bounds = array<i64: 1, 8, 2>}]} {
    %c0 = arith.constant 0 : index
    %c0_0 = arith.constant 0 : index
    %0 = vector.load %arg2[%c0, %c0_0] : memref<8x3xf32, #tpu.memory_space<vmem>>, vector<8x3xf32>
    %c0_1 = arith.constant 0 : index
    %c0_2 = arith.constant 0 : index
    %c0_3 = arith.constant 0 : index
    %1 = vector.load %arg1[%c0_1, %c0_2, %c0_3] : memref<1x8x256xf32, #tpu.memory_space<vmem>>, vector<1x8x256xf32>
    %2 = vector.shape_cast %1 : vector<1x8x256xf32> to vector<8x256xf32>
    %3 = vector.extract_strided_slice %0 {offsets = [0, 0], sizes = [8, 1], strides = [1, 1]} : vector<8x3xf32> to vector<8x1xf32>
    %4 = vector.broadcast %3 : vector<8x1xf32> to vector<8x256xf32>
    %5 = arith.mulf %2, %4 : vector<8x256xf32>
    %6 = vector.extract_strided_slice %0 {offsets = [0, 1], sizes = [8, 1], strides = [1, 1]} : vector<8x3xf32> to vector<8x1xf32>
    %7 = vector.broadcast %6 : vector<8x1xf32> to vector<8x256xf32>
    %8 = arith.addf %5, %7 : vector<8x256xf32>
    %cst = arith.constant 0.000000e+00 : f32
    %9 = vector.broadcast %cst : f32 to vector<8x256xf32>
    %10 = arith.maximumf %8, %9 : vector<8x256xf32>
    %c4 = arith.constant 4 : index
    %c0_4 = arith.constant 0 : index
    %c0_5 = arith.constant 0 : index
    %11 = vector.load %arg3[%c4, %c0_4, %c0_5] : memref<9x8x256xf32, #tpu.memory_space<vmem>>, vector<1x8x256xf32>
    %12 = vector.shape_cast %11 : vector<1x8x256xf32> to vector<8x256xf32>
    %13 = arith.mulf %12, %10 : vector<8x256xf32>
    %c0_6 = arith.constant 0 : index
    %c0_7 = arith.constant 0 : index
    %c0_8 = arith.constant 0 : index
    %14 = vector.load %arg3[%c0_6, %c0_7, %c0_8] : memref<9x8x256xf32, #tpu.memory_space<vmem>>, vector<1x8x256xf32>
    %15 = vector.shape_cast %14 : vector<1x8x256xf32> to vector<8x256xf32>
    %c17_i32 = arith.constant 17 : i32
    %16 = tpu.dynamic_rotate %10 by %c17_i32 dim 1 : vector<8x256xf32>, i32 -> vector<8x256xf32>
    %17 = arith.mulf %15, %16 : vector<8x256xf32>
    %18 = arith.addf %13, %17 : vector<8x256xf32>
    %c1 = arith.constant 1 : index
    %c0_9 = arith.constant 0 : index
    %c0_10 = arith.constant 0 : index
    %19 = vector.load %arg3[%c1, %c0_9, %c0_10] : memref<9x8x256xf32, #tpu.memory_space<vmem>>, vector<1x8x256xf32>
    %20 = vector.shape_cast %19 : vector<1x8x256xf32> to vector<8x256xf32>
    %c16_i32 = arith.constant 16 : i32
    %21 = tpu.dynamic_rotate %10 by %c16_i32 dim 1 : vector<8x256xf32>, i32 -> vector<8x256xf32>
    %22 = arith.mulf %20, %21 : vector<8x256xf32>
    %23 = arith.addf %18, %22 : vector<8x256xf32>
    %c2 = arith.constant 2 : index
    %c0_11 = arith.constant 0 : index
    %c0_12 = arith.constant 0 : index
    %24 = vector.load %arg3[%c2, %c0_11, %c0_12] : memref<9x8x256xf32, #tpu.memory_space<vmem>>, vector<1x8x256xf32>
    %25 = vector.shape_cast %24 : vector<1x8x256xf32> to vector<8x256xf32>
    %c15_i32 = arith.constant 15 : i32
    %26 = tpu.dynamic_rotate %10 by %c15_i32 dim 1 : vector<8x256xf32>, i32 -> vector<8x256xf32>
    %27 = arith.mulf %25, %26 : vector<8x256xf32>
    %28 = arith.addf %23, %27 : vector<8x256xf32>
    %c3 = arith.constant 3 : index
    %c0_13 = arith.constant 0 : index
    %c0_14 = arith.constant 0 : index
    %29 = vector.load %arg3[%c3, %c0_13, %c0_14] : memref<9x8x256xf32, #tpu.memory_space<vmem>>, vector<1x8x256xf32>
    %30 = vector.shape_cast %29 : vector<1x8x256xf32> to vector<8x256xf32>
    %c1_i32 = arith.constant 1 : i32
    %31 = tpu.dynamic_rotate %10 by %c1_i32 dim 1 : vector<8x256xf32>, i32 -> vector<8x256xf32>
    %32 = arith.mulf %30, %31 : vector<8x256xf32>
    %33 = arith.addf %28, %32 : vector<8x256xf32>
    %c5 = arith.constant 5 : index
    %c0_15 = arith.constant 0 : index
    %c0_16 = arith.constant 0 : index
    %34 = vector.load %arg3[%c5, %c0_15, %c0_16] : memref<9x8x256xf32, #tpu.memory_space<vmem>>, vector<1x8x256xf32>
    %35 = vector.shape_cast %34 : vector<1x8x256xf32> to vector<8x256xf32>
    %c255_i32 = arith.constant 255 : i32
    %36 = tpu.dynamic_rotate %10 by %c255_i32 dim 1 : vector<8x256xf32>, i32 -> vector<8x256xf32>
    %37 = arith.mulf %35, %36 : vector<8x256xf32>
    %38 = arith.addf %33, %37 : vector<8x256xf32>
    %c6 = arith.constant 6 : index
    %c0_17 = arith.constant 0 : index
    %c0_18 = arith.constant 0 : index
    %39 = vector.load %arg3[%c6, %c0_17, %c0_18] : memref<9x8x256xf32, #tpu.memory_space<vmem>>, vector<1x8x256xf32>
    %40 = vector.shape_cast %39 : vector<1x8x256xf32> to vector<8x256xf32>
    %c241_i32 = arith.constant 241 : i32
    %41 = tpu.dynamic_rotate %10 by %c241_i32 dim 1 : vector<8x256xf32>, i32 -> vector<8x256xf32>
    %42 = arith.mulf %40, %41 : vector<8x256xf32>
    %43 = arith.addf %38, %42 : vector<8x256xf32>
    %c7 = arith.constant 7 : index
    %c0_19 = arith.constant 0 : index
    %c0_20 = arith.constant 0 : index
    %44 = vector.load %arg3[%c7, %c0_19, %c0_20] : memref<9x8x256xf32, #tpu.memory_space<vmem>>, vector<1x8x256xf32>
    %45 = vector.shape_cast %44 : vector<1x8x256xf32> to vector<8x256xf32>
    %c240_i32 = arith.constant 240 : i32
    %46 = tpu.dynamic_rotate %10 by %c240_i32 dim 1 : vector<8x256xf32>, i32 -> vector<8x256xf32>
    %47 = arith.mulf %45, %46 : vector<8x256xf32>
    %48 = arith.addf %43, %47 : vector<8x256xf32>
    %c8 = arith.constant 8 : index
    %c0_21 = arith.constant 0 : index
    %c0_22 = arith.constant 0 : index
    %49 = vector.load %arg3[%c8, %c0_21, %c0_22] : memref<9x8x256xf32, #tpu.memory_space<vmem>>, vector<1x8x256xf32>
    %50 = vector.shape_cast %49 : vector<1x8x256xf32> to vector<8x256xf32>
    %c239_i32 = arith.constant 239 : i32
    %51 = tpu.dynamic_rotate %10 by %c239_i32 dim 1 : vector<8x256xf32>, i32 -> vector<8x256xf32>
    %52 = arith.mulf %50, %51 : vector<8x256xf32>
    %53 = arith.addf %48, %52 : vector<8x256xf32>
    %54 = vector.extract_strided_slice %0 {offsets = [0, 2], sizes = [8, 1], strides = [1, 1]} : vector<8x3xf32> to vector<8x1xf32>
    %55 = vector.broadcast %54 : vector<8x1xf32> to vector<8x256xf32>
    %56 = arith.addf %53, %55 : vector<8x256xf32>
    %c0_23 = arith.constant 0 : index
    %c0_24 = arith.constant 0 : index
    %c0_25 = arith.constant 0 : index
    %57 = vector.load %arg4[%c0_23, %c0_24, %c0_25] : memref<1x8x256xf32, #tpu.memory_space<vmem>>, vector<1x8x256xf32>
    %58 = vector.shape_cast %57 : vector<1x8x256xf32> to vector<8x256xf32>
    %59 = vector.shape_cast %56 : vector<8x256xf32> to vector<1x8x256xf32>
    tpu.vector_store %arg4[%c0_23, %c0_24, %c0_25], %59 {strides = array<i32>} : memref<1x8x256xf32, #tpu.memory_space<vmem>>, vector<1x8x256xf32>,
    %cst_26 = arith.constant 1.000000e+00 : f32
    %60 = vector.broadcast %cst_26 : f32 to vector<256x1xf32>
    %cst_27 = arith.constant dense<0.000000e+00> : vector<8x1xf32>
    %61 = tpu.matmul %56, %60, %cst_27 {dimension_numbers = #tpu.dot_dimension_numbers<[1], [0], [0], [1], [0, 0, 1, 1], [], []>} : vector<8x256xf32>, vector<256x1xf32>, vector<8x1xf32> -> vector<8x1xf32>
    %62 = arith.mulf %56, %56 : vector<8x256xf32>
    %cst_28 = arith.constant dense<0.000000e+00> : vector<8x1xf32>
    %63 = tpu.matmul %62, %60, %cst_28 {dimension_numbers = #tpu.dot_dimension_numbers<[1], [0], [0], [1], [0, 0, 1, 1], [], []>} : vector<8x256xf32>, vector<256x1xf32>, vector<8x1xf32> -> vector<8x1xf32>
    %64 = tpu.concatenate %61, %63 in 1 : vector<8x1xf32>, vector<8x1xf32> -> vector<8x2xf32>
    %c0_29 = arith.constant 0 : index
    %c0_30 = arith.constant 0 : index
    %c0_31 = arith.constant 0 : index
    %65 = vector.load %arg5[%c0_29, %c0_30, %c0_31] : memref<1x8x2xf32, #tpu.memory_space<vmem>>, vector<1x8x2xf32>
    %66 = vector.shape_cast %65 : vector<1x8x2xf32> to vector<8x2xf32>
    %67 = vector.shape_cast %64 : vector<8x2xf32> to vector<1x8x2xf32>
    tpu.vector_store %arg5[%c0_29, %c0_30, %c0_31], %67 {strides = array<i32>} : memref<1x8x2xf32, #tpu.memory_space<vmem>>, vector<1x8x2xf32>,
    return
  }
  func.func @transform_0(%arg0: i32) -> (i32, i32, i32) {
    %c0_i32 = arith.constant 0 : i32
    %c0_i32_0 = arith.constant 0 : i32
    %c0_i32_1 = arith.constant 0 : i32
    return %arg0, %c0_i32, %c0_i32_0 : i32, i32, i32
  }
  func.func @transform_1(%arg0: i32) -> (i32, i32) {
    %c0_i32 = arith.constant 0 : i32
    %c0_i32_0 = arith.constant 0 : i32
    %c0_i32_1 = arith.constant 0 : i32
    return %c0_i32, %c0_i32_0 : i32, i32
  }
  func.func @transform_2(%arg0: i32) -> (i32, i32, i32) {
    %c0_i32 = arith.constant 0 : i32
    %c0_i32_0 = arith.constant 0 : i32
    %c0_i32_1 = arith.constant 0 : i32
    %c0_i32_2 = arith.constant 0 : i32
    return %c0_i32, %c0_i32_0, %c0_i32_1 : i32, i32, i32
  }
  func.func @transform_3(%arg0: i32) -> (i32, i32, i32) {
    %c0_i32 = arith.constant 0 : i32
    %c0_i32_0 = arith.constant 0 : i32
    %c0_i32_1 = arith.constant 0 : i32
    return %arg0, %c0_i32, %c0_i32_0 : i32, i32, i32
  }
  func.func @transform_4(%arg0: i32) -> (i32, i32, i32) {
    %c0_i32 = arith.constant 0 : i32
    %c0_i32_0 = arith.constant 0 : i32
    %c0_i32_1 = arith.constant 0 : i32
    return %arg0, %c0_i32, %c0_i32_0 : i32, i32, i32
  }
}

module attributes {stable_mosaic.version = 11 : i64} {
  func.func @_conv5_stats_kernel(%arg0: i32, %arg1: i32, %arg2: memref<1x8x256xf32, #tpu.memory_space<vmem>>, %arg3: memref<24x8xf32, #tpu.memory_space<vmem>>, %arg4: memref<24x1xf32, #tpu.memory_space<vmem>>, %arg5: memref<1x1x24x2xf32, #tpu.memory_space<vmem>>) attributes {dimension_semantics = [#tpu.dimension_semantics<parallel>, #tpu.dimension_semantics<parallel>], iteration_bounds = array<i64: 2, 1>, scalar_prefetch = 0 : i64, scratch_operands = 0 : i64, tpu.core_type = #tpu.core_type<tc>, window_params = [{transform_indices = @transform_0, window_bounds = array<i64: 1, 8, 256>}, {pipeline_mode = #tpu.pipeline_mode<synchronous>, transform_indices = @transform_1, window_bounds = array<i64: 24, 8>}, {pipeline_mode = #tpu.pipeline_mode<synchronous>, transform_indices = @transform_2, window_bounds = array<i64: 24, 1>}, {transform_indices = @transform_3, window_bounds = array<i64: 1, 1, 24, 2>}]} {
    %c0 = arith.constant 0 : index
    %c0_0 = arith.constant 0 : index
    %c0_1 = arith.constant 0 : index
    %0 = vector.load %arg2[%c0, %c0_0, %c0_1] : memref<1x8x256xf32, #tpu.memory_space<vmem>>, vector<1x8x256xf32>
    %1 = vector.shape_cast %0 : vector<1x8x256xf32> to vector<8x256xf32>
    %c0_2 = arith.constant 0 : index
    %c0_3 = arith.constant 0 : index
    %2 = vector.load %arg3[%c0_2, %c0_3] : memref<24x8xf32, #tpu.memory_space<vmem>>, vector<24x8xf32>
    %cst = arith.constant dense<0.000000e+00> : vector<24x256xf32>
    %3 = tpu.matmul %2, %1, %cst {dimension_numbers = #tpu.dot_dimension_numbers<[1], [0], [0], [1], [0, 0, 1, 1], [], []>} : vector<24x8xf32>, vector<8x256xf32>, vector<24x256xf32> -> vector<24x256xf32>
    %c0_4 = arith.constant 0 : index
    %c0_5 = arith.constant 0 : index
    %4 = vector.load %arg4[%c0_4, %c0_5] : memref<24x1xf32, #tpu.memory_space<vmem>>, vector<24x1xf32>
    %5 = vector.broadcast %4 : vector<24x1xf32> to vector<24x256xf32>
    %6 = arith.addf %3, %5 : vector<24x256xf32>
    %cst_6 = arith.constant 1.000000e+00 : f32
    %7 = vector.broadcast %cst_6 : f32 to vector<256x1xf32>
    %cst_7 = arith.constant dense<0.000000e+00> : vector<24x1xf32>
    %8 = tpu.matmul %6, %7, %cst_7 {dimension_numbers = #tpu.dot_dimension_numbers<[1], [0], [0], [1], [0, 0, 1, 1], [], []>} : vector<24x256xf32>, vector<256x1xf32>, vector<24x1xf32> -> vector<24x1xf32>
    %9 = arith.mulf %6, %6 : vector<24x256xf32>
    %cst_8 = arith.constant dense<0.000000e+00> : vector<24x1xf32>
    %10 = tpu.matmul %9, %7, %cst_8 {dimension_numbers = #tpu.dot_dimension_numbers<[1], [0], [0], [1], [0, 0, 1, 1], [], []>} : vector<24x256xf32>, vector<256x1xf32>, vector<24x1xf32> -> vector<24x1xf32>
    %11 = tpu.concatenate %8, %10 in 1 : vector<24x1xf32>, vector<24x1xf32> -> vector<24x2xf32>
    %c0_9 = arith.constant 0 : index
    %c0_10 = arith.constant 0 : index
    %c0_11 = arith.constant 0 : index
    %c0_12 = arith.constant 0 : index
    %12 = vector.load %arg5[%c0_9, %c0_10, %c0_11, %c0_12] : memref<1x1x24x2xf32, #tpu.memory_space<vmem>>, vector<1x1x24x2xf32>
    %13 = vector.shape_cast %12 : vector<1x1x24x2xf32> to vector<24x2xf32>
    %14 = vector.shape_cast %11 : vector<24x2xf32> to vector<1x1x24x2xf32>
    tpu.vector_store %arg5[%c0_9, %c0_10, %c0_11, %c0_12], %14 {strides = array<i32>} : memref<1x1x24x2xf32, #tpu.memory_space<vmem>>, vector<1x1x24x2xf32>,
    return
  }
  func.func @transform_0(%arg0: i32, %arg1: i32) -> (i32, i32, i32) {
    %c0_i32 = arith.constant 0 : i32
    %c0_i32_0 = arith.constant 0 : i32
    return %arg0, %c0_i32, %arg1 : i32, i32, i32
  }
  func.func @transform_1(%arg0: i32, %arg1: i32) -> (i32, i32) {
    %c0_i32 = arith.constant 0 : i32
    %c0_i32_0 = arith.constant 0 : i32
    %c0_i32_1 = arith.constant 0 : i32
    return %c0_i32, %c0_i32_0 : i32, i32
  }
  func.func @transform_2(%arg0: i32, %arg1: i32) -> (i32, i32) {
    %c0_i32 = arith.constant 0 : i32
    %c0_i32_0 = arith.constant 0 : i32
    %c0_i32_1 = arith.constant 0 : i32
    return %c0_i32, %c0_i32_0 : i32, i32
  }
  func.func @transform_3(%arg0: i32, %arg1: i32) -> (i32, i32, i32, i32) {
    %c0_i32 = arith.constant 0 : i32
    %c0_i32_0 = arith.constant 0 : i32
    %c0_i32_1 = arith.constant 0 : i32
    return %arg0, %arg1, %c0_i32, %c0_i32_0 : i32, i32, i32, i32
  }
}

module attributes {stable_mosaic.version = 11 : i64} {
  func.func @_final_kernel(%arg0: i32, %arg1: i32, %arg2: memref<1x8x256xf32, #tpu.memory_space<vmem>>, %arg3: memref<1x24x256xf32, #tpu.memory_space<vmem>>, %arg4: memref<24x8xf32, #tpu.memory_space<vmem>>, %arg5: memref<24x1xf32, #tpu.memory_space<vmem>>, %arg6: memref<1x24x256xf32, #tpu.memory_space<vmem>>) attributes {dimension_semantics = [#tpu.dimension_semantics<parallel>, #tpu.dimension_semantics<parallel>], iteration_bounds = array<i64: 2, 1>, scalar_prefetch = 0 : i64, scratch_operands = 0 : i64, tpu.core_type = #tpu.core_type<tc>, window_params = [{transform_indices = @transform_0, window_bounds = array<i64: 1, 8, 256>}, {transform_indices = @transform_1, window_bounds = array<i64: 1, 24, 256>}, {pipeline_mode = #tpu.pipeline_mode<synchronous>, transform_indices = @transform_2, window_bounds = array<i64: 24, 8>}, {pipeline_mode = #tpu.pipeline_mode<synchronous>, transform_indices = @transform_3, window_bounds = array<i64: 24, 1>}, {transform_indices = @transform_4, window_bounds = array<i64: 1, 24, 256>}]} {
    %c0 = arith.constant 0 : index
    %c0_0 = arith.constant 0 : index
    %c0_1 = arith.constant 0 : index
    %0 = vector.load %arg2[%c0, %c0_0, %c0_1] : memref<1x8x256xf32, #tpu.memory_space<vmem>>, vector<1x8x256xf32>
    %1 = vector.shape_cast %0 : vector<1x8x256xf32> to vector<8x256xf32>
    %c0_2 = arith.constant 0 : index
    %c0_3 = arith.constant 0 : index
    %2 = vector.load %arg4[%c0_2, %c0_3] : memref<24x8xf32, #tpu.memory_space<vmem>>, vector<24x8xf32>
    %cst = arith.constant dense<0.000000e+00> : vector<24x256xf32>
    %3 = tpu.matmul %2, %1, %cst {dimension_numbers = #tpu.dot_dimension_numbers<[1], [0], [0], [1], [0, 0, 1, 1], [], []>} : vector<24x8xf32>, vector<8x256xf32>, vector<24x256xf32> -> vector<24x256xf32>
    %c0_4 = arith.constant 0 : index
    %c0_5 = arith.constant 0 : index
    %4 = vector.load %arg5[%c0_4, %c0_5] : memref<24x1xf32, #tpu.memory_space<vmem>>, vector<24x1xf32>
    %5 = vector.broadcast %4 : vector<24x1xf32> to vector<24x256xf32>
    %6 = arith.addf %3, %5 : vector<24x256xf32>
    %c0_6 = arith.constant 0 : index
    %c0_7 = arith.constant 0 : index
    %c0_8 = arith.constant 0 : index
    %7 = vector.load %arg3[%c0_6, %c0_7, %c0_8] : memref<1x24x256xf32, #tpu.memory_space<vmem>>, vector<1x24x256xf32>
    %8 = vector.shape_cast %7 : vector<1x24x256xf32> to vector<24x256xf32>
    %9 = arith.addf %8, %6 : vector<24x256xf32>
    %cst_9 = arith.constant 0.000000e+00 : f32
    %10 = vector.broadcast %cst_9 : f32 to vector<24x256xf32>
    %11 = arith.maximumf %9, %10 : vector<24x256xf32>
    %c0_10 = arith.constant 0 : index
    %c0_11 = arith.constant 0 : index
    %c0_12 = arith.constant 0 : index
    %12 = vector.load %arg6[%c0_10, %c0_11, %c0_12] : memref<1x24x256xf32, #tpu.memory_space<vmem>>, vector<1x24x256xf32>
    %13 = vector.shape_cast %12 : vector<1x24x256xf32> to vector<24x256xf32>
    %14 = vector.shape_cast %11 : vector<24x256xf32> to vector<1x24x256xf32>
    tpu.vector_store %arg6[%c0_10, %c0_11, %c0_12], %14 {strides = array<i32>} : memref<1x24x256xf32, #tpu.memory_space<vmem>>, vector<1x24x256xf32>,
    return
  }
  func.func @transform_0(%arg0: i32, %arg1: i32) -> (i32, i32, i32) {
    %c0_i32 = arith.constant 0 : i32
    %c0_i32_0 = arith.constant 0 : i32
    return %arg0, %c0_i32, %arg1 : i32, i32, i32
  }
  func.func @transform_1(%arg0: i32, %arg1: i32) -> (i32, i32, i32) {
    %c0_i32 = arith.constant 0 : i32
    %c0_i32_0 = arith.constant 0 : i32
    return %arg0, %c0_i32, %arg1 : i32, i32, i32
  }
  func.func @transform_2(%arg0: i32, %arg1: i32) -> (i32, i32) {
    %c0_i32 = arith.constant 0 : i32
    %c0_i32_0 = arith.constant 0 : i32
    %c0_i32_1 = arith.constant 0 : i32
    return %c0_i32, %c0_i32_0 : i32, i32
  }
  func.func @transform_3(%arg0: i32, %arg1: i32) -> (i32, i32) {
    %c0_i32 = arith.constant 0 : i32
    %c0_i32_0 = arith.constant 0 : i32
    %c0_i32_1 = arith.constant 0 : i32
    return %c0_i32, %c0_i32_0 : i32, i32
  }
  func.func @transform_4(%arg0: i32, %arg1: i32) -> (i32, i32, i32) {
    %c0_i32 = arith.constant 0 : i32
    %c0_i32_0 = arith.constant 0 : i32
    return %arg0, %c0_i32, %arg1 : i32, i32, i32
  }
}

</mosaic_0001>

<bundles_post_ra>
// kernel: _pipeline.4
= control target key start
LH: loop header
LB: loop body
LE: loop exit
PB: predicated region body
PF: predicated region fallthrough
CT: control target
= control target key end

     0   :  { %10 = vsyncpa [#allocation3], 0  ;;  %s897_s0 = inlined_call_operand.hbm [shape: f32[2,24,256], index: 0, kind: input, shape index: {}]   ;;  %s898_s1 = inlined_call_operand.vmem [shape: f32[8,24], index: 1, kind: input, shape index: {}]   ;;  %s899_s2 = inlined_call_operand.vmem [shape: f32[8,1], index: 2, kind: input, shape index: {}]   ;;  %s900_s3 = inlined_call_operand.vmem [shape: f32[2,8,256], index: 3, kind: output, shape index: {0}]   ;;  %s901_s4 = inlined_call_operand.vmem [shape: f32[2,1,8,2], index: 4, kind: output, shape index: {1}]  }
   0x1   :  { %12 = vsyncpa [#allocation3 + $0x1], 0  ;;  %s742_s15 = smov 0   ;;  %s744_s16 = smov 0  }
   0x2   :  { %s746_s17 = smov 0   ;;  %s748_s18 = smov 0  }
   0x3   :  { %s750_s19 = smov 0   ;;  %s752_s20 = smov 0  }
   0x4 LB: > { %s552_s21 = sadd.s32 4294967295, %s710_s20   ;;  %s30_s22 = sadd.s32 1, %s706_s19  ;;  %s710_s20 = sphi %s752_s20, %s18_s20   ;;  %s706_s19 = sphi %s750_s19, %s907_s19   ;;  %s702_s18 = sphi %s748_s18, %s906_s18   ;;  %s698_s17 = sphi %s746_s17, %s905_s17   ;;  %s694_s16 = sphi %s744_s16, %s904_s16   ;;  %s690_s15 = sphi %s742_s15, %s903_s15  }
   0x5   : > { %p32_p0 = scmp.ge.s32.totalorder %s30_s22, 2  ;;  %s39_s23 = sadd.s32 1, %s698_s17 }
   0x6   : > { %p46_p1 = scmp.ne.s32.totalorder %s698_s17, %s694_s16  ;;  %p47_p2 = scmp.eq.s32.totalorder %s710_s20, 0 }
   0x7   : > { %s909_s22 = smov (%p32_p0, %s30_s22), 0  ;;  %p52_p4 = scmp.ne.s32.totalorder %s694_s16, %s690_s15 }
   0x8   : > { %p48_p3 = por %p47_p2, %p46_p1  ;;  %s34_s24 = ssub.s32 %s706_s19, %s909_s22 }
   0x9   : > { %p53_p5 = scmp.eq.s32.totalorder %s552_s21, 0  ;;  %p37_p6 = scmp.eq.s32.totalorder %s34_s24, 0 }
   0xa   : > { %p575_p8 = scmp.lt.s32.totalorder %s710_s20, 2  ;;  %s180_s27 = sand.u32 1, %s698_s17  }
   0xb   : > { %p781_p7 = por %p53_p5, %p52_p4  ;;  %s567_s28 = smul.u32 48, %s706_s19 }
   0xc   : > { %s787_s26 = scalar_select %p37_p6, %s698_s17, %s39_s23  }
   0xd   : > { %s566_s29 = smul.u32 48, %s180_s27  ;;  %s191_s6 = scalar_lea.hbm %s897_s0, %s567_s28 }
   0xe   : > { %p572_p9 = pnand %p575_p8, %p48_p3  ;;  %s192_s7 = sshll.u32 %s191_s6, 4  ;;  %s193_s7 = int_to_ptr.hbm [resolvable:$true] %s192_s7 }
   0xf   : > { %s184_s8 = scalar_lea.vmem [#allocation2], %s566_s29  ;;  %s181_s10 = scalar_lea.sflag [#allocation3], %s180_s27 }
  0x10   : > { %s194_s9 = sshll.u32 %s184_s8, 4  ;;  %s712_s11 = smov 256   ;;  %s195_s9 = int_to_ptr.vmem [resolvable:$true] %s194_s9 }
  0x11   : > { %s713_s12 = smov 16   ;;  %p557_p10 = scmp.ge.s32.totalorder %s710_s20, 1 }
  0x12   : > { %574 = dma.hbm_to_vmem [thread:$0]  (!%p572_p9), %s193_s7, 768, %s195_s9, %s181_s10, %s712_s11, %s712_s11, %s713_s12  }
  0x13   : > { %p202_p11 = scmp.lt.s32.totalorder %s710_s20, 3 }
  0x15   : > { %p203_p12 = pnand %p557_p10, %p202_p11 }
  0x16   : > { %s208_s13 = sand.u32 (!%p203_p12), 1, %s694_s16  }
  0x17   : > { %206 = sbr.rel (%p203_p12) target bundleno = 414 (0x19e), region = 32  ;;  %s209_s15 = scalar_lea.sflag (!%p203_p12), [#allocation3], %s208_s13 }
  0x18   : > { %s568_s14 = smul.u32 (!%p203_p12), 48, %s208_s13 }
  0x1a   : > { %s212_s21 = scalar_lea.vmem (!%p203_p12), [#allocation2], %s568_s14 }
  0x1c   : > { %685 = dma.done.wait (%p781_p7), %s209_s15, 768  }
  0x1d   : > { %687 = vsyncadd (%p781_p7), %s209_s15, 4294966528  ;;  %v714_v0 = vmov 0   ;;  %v715_v1 = vmov 1.0   ;;  %v271_v2 = vld [vmem:[%s212_s21 + $0x20] sm:$0xff]  ;;  %v272_v3 = vld [vmem:[%s212_s21 + $0x28] sm:$0xff]  ;;  %vm280_vm0 = vcmask 195584  }
  0x1e   : > { %629 = vset.pattern.permute.xlu0 %v714_v0  ;;  %326 = vmatpush.msra.mxu2 %v715_v1  ;;  %v269_v4 = vld [vmem:[%s212_s21 + $0x10] sm:$0xff]  ;;  %v270_v5 = vld [vmem:[%s212_s21 + $0x18] sm:$0xff]  ;;  %v267_v6 = vld [vmem:[%s212_s21] sm:$0xff]  ;;  %p251_p13 = scmp.lt.s32.totalorder %s702_s18, 1  ;;  %s716_s6 = smov 1   ;;  %vm412_vm1 = vcmask 7168  }
  0x1f   : > { %346 = vmatpush.msra.mxu3 %v715_v1  ;;  %297 = vmatpush.msra.mxu0 %v271_v2  ;;  %v268_v7 = vld [vmem:[%s212_s21 + $0x8] sm:$0xff]  ;;  %v274_v8 = vld [vmem:[%s899_s2] sm:$0xff]  ;;  %vm414_vm2 = vcmask 15360  }
  0x20   : > { %327 = vmatpush.msra.mxu2 %v715_v1  ;;  %317 = vmatpush.msra.mxu1 %v272_v3  ;;  %v273_v9 = vld [vmem:[%s898_s1] sm:$0xff]  ;;  %s911_s18 = smov (!%p251_p13, %s702_s18), 1 }
  0x21   : > { %347 = vmatpush.msra.mxu3 %v715_v1  ;;  %298 = vmatpush.msra.mxu0 %v269_v4  ;;  %s565_s28 = sshll.u32 %s911_s18, 4  ;;  %s560_s7 = sshll.u32 %s911_s18, 3 }
  0x22   : > { %328 = vmatpush.msra.mxu2 %v715_v1  ;;  %318 = vmatpush.msra.mxu1 %v270_v5  ;;  %s258_s5 = scalar_lea.vmem %s900_s3, %s565_s28  ;;  %s266_s10 = scalar_lea.vmem %s901_s4, %s560_s7 }
  0x23   : > { %348 = vmatpush.msra.mxu3 %v715_v1  ;;  %277 = vperm.xlu0 %629, %v274_v8  }
  0x24   : > { %329 = vmatpush.msra.mxu2 %v715_v1  ;;  %299 = vmatpush.msra.mxu0 %v267_v6 }
  0x25   : > { %349 = vmatpush.msra.mxu3 %v715_v1  ;;  %319 = vmatpush.msra.mxu1 %v268_v7 }
  0x26   : > { %330 = vmatpush.msra.mxu2 %v715_v1  ;;  %561 = vmatmul.msk.f32.vlgmr.msra.gmra.mxu0 %vm280_vm0, %v273_v9 }
  0x27   : > { %350 = vmatpush.msra.mxu3 %v715_v1  ;;  %562 = vmatmul.msk.f32.vlgmr.msra.gmra.mxu1 %vm280_vm0, %v273_v9 }
  0x28   : > { %368 = vmatpush.msrb.mxu0 %v715_v1  ;;  %388 = vmatpush.msrb.mxu1 %v715_v1 }
  0x29   : > { %331 = vmatpush.msra.mxu2 %v715_v1  ;;  %351 = vmatpush.msra.mxu3 %v715_v1 }
  0x2a   : > { %369 = vmatpush.msrb.mxu0 %v715_v1  ;;  %389 = vmatpush.msrb.mxu1 %v715_v1 }
  0x2b   : > { %332 = vmatpush.msra.mxu2 %v715_v1  ;;  %352 = vmatpush.msra.mxu3 %v715_v1 }
  0x2c   : > { %370 = vmatpush.msrb.mxu0 %v715_v1  ;;  %390 = vmatpush.msrb.mxu1 %v715_v1 }
  0x2d   : > { %333 = vmatpush.msra.mxu2 %v715_v1  ;;  %353 = vmatpush.msra.mxu3 %v715_v1 }
  0x2e   : > { %371 = vmatpush.msrb.mxu0 %v715_v1  ;;  %391 = vmatpush.msrb.mxu1 %v715_v1 }
  0x2f   : > { %334 = vmatpush.msra.mxu2 %v715_v1  ;;  %354 = vmatpush.msra.mxu3 %v715_v1 }
  0x30   : > { %372 = vmatpush.msrb.mxu0 %v715_v1  ;;  %392 = vmatpush.msrb.mxu1 %v715_v1 }
  0x31   : > { %335 = vmatpush.msra.mxu2 %v715_v1  ;;  %355 = vmatpush.msra.mxu3 %v715_v1 }
  0x32   : > { %373 = vmatpush.msrb.mxu0 %v715_v1  ;;  %393 = vmatpush.msrb.mxu1 %v715_v1 }
  0x33   : > { %336 = vmatpush.msra.mxu2 %v715_v1  ;;  %356 = vmatpush.msra.mxu3 %v715_v1 }
  0x34   : > { %374 = vmatpush.msrb.mxu0 %v715_v1  ;;  %394 = vmatpush.msrb.mxu1 %v715_v1 }
  0x35   : > { %337 = vmatpush.msra.mxu2 %v715_v1  ;;  %357 = vmatpush.msra.mxu3 %v715_v1 }
  0x36   : > { %375 = vmatpush.msrb.mxu0 %v715_v1  ;;  %395 = vmatpush.msrb.mxu1 %v715_v1 }
  0x37   : > { %338 = vmatpush.msra.mxu2 %v715_v1  ;;  %358 = vmatpush.msra.mxu3 %v715_v1 }
  0x38   : > { %376 = vmatpush.msrb.mxu0 %v715_v1  ;;  %396 = vmatpush.msrb.mxu1 %v715_v1 }
  0x39   : > { %339 = vmatpush.msra.mxu2 %v715_v1  ;;  %359 = vmatpush.msra.mxu3 %v715_v1 }
  0x3a   : > { %377 = vmatpush.msrb.mxu0 %v715_v1  ;;  %397 = vmatpush.msrb.mxu1 %v715_v1 }
  0x3b   : > { %340 = vmatpush.msra.mxu2 %v715_v1  ;;  %360 = vmatpush.msra.mxu3 %v715_v1 }
  0x3c   : > { %378 = vmatpush.msrb.mxu0 %v715_v1  ;;  %398 = vmatpush.msrb.mxu1 %v715_v1 }
  0x3d   : > { %341 = vmatpush.msra.mxu2 %v715_v1  ;;  %361 = vmatpush.msra.mxu3 %v715_v1 }
  0x3e   : > { %379 = vmatpush.msrb.mxu0 %v715_v1  ;;  %399 = vmatpush.msrb.mxu1 %v715_v1 }
  0x40   : > { %380 = vmatpush.msrb.mxu0 %v715_v1  ;;  %400 = vmatpush.msrb.mxu1 %v715_v1 }
  0x42   : > { %381 = vmatpush.msrb.mxu0 %v715_v1  ;;  %401 = vmatpush.msrb.mxu1 %v715_v1 }
  0x44   : > { %382 = vmatpush.msrb.mxu0 %v715_v1  ;;  %402 = vmatpush.msrb.mxu1 %v715_v1 }
  0x46   : > { %383 = vmatpush.msrb.mxu0 %v715_v1  ;;  %403 = vmatpush.msrb.mxu1 %v715_v1 }
  0x95   : > { %v278_v10 = vpop.permute.xlu0 %277 }
  0xa3   : > { %v301_v11 = vpop.f32.mrf.mxu0 }
  0xa4   : > { %v321_v12 = vpop.f32.mrf.mxu1  ;;  %v302_v13 = vadd.f32 %v301_v11, %v278_v10 }
  0xa5   : > { %v322_v14 = vadd.f32 %v321_v12, %v278_v10 }
  0xa6   : > { %324 = vst [vmem:[%s258_s5] sm:$0xff] %v302_v13  ;;  %342 = vmatmul.f32.vlgmr.msra.gmra.mxu2 %v302_v13  ;;  %v366_v15 = vmul.f32 %v302_v13, %v302_v13 }
  0xa7   : > { %362 = vmatmul.f32.vlgmr.msra.gmra.mxu3 %v322_v14  ;;  %v367_v16 = vmul.f32 %v322_v14, %v322_v14  ;;  %325 = vst [vmem:[%s258_s5 + $0x8] sm:$0xff] %v322_v14 }
  0xa8   : > { %384 = vmatmul.f32.vlgmr.msrb.gmra.mxu0 %v366_v15 }
  0xa9   : > { %404 = vmatmul.f32.vlgmr.msrb.gmra.mxu1 %v367_v16 }
 0x125   : > { %v385_v17 = vpop.f32.mrf.mxu0 }
 0x126   : > { %v405_v18 = vpop.f32.mrf.mxu1 }
 0x127   : > { %v406_v19 = vadd.f32 %v405_v18, %v385_v17 }
 0x129   : > { %409 = vrot.lane.b32.xlu0 %v406_v19, %s716_s6  ;;  %v343_v20 = vpop.f32.mrf.mxu2 }
 0x12a   : > { %v363_v21 = vpop.f32.mrf.mxu3 }
 0x12b   : > { %v364_v22 = vadd.f32 %v363_v21, %v343_v20 }
 0x19b   : > { %v410_v23 = vpop.permute.xlu0 %409 }
 0x19c   : > { %v413_v24 = vsel %vm412_vm1, %v364_v22, %v410_v23 }
 0x19d   : > { %415 = vst.msk [vmem:[%s266_s10] sm:$0xff] %vm414_vm2, %v413_v24 }
 0x19e PF: > { %s18_s20 = sadd.s32 1, %s710_s20   ;;  %s903_s15 = smov %s694_s16 }
 0x19f   : > { %p15_p0 = scmp.ge.s32.totalorder %s18_s20, 4   ;;  %s904_s16 = smov %s698_s17 }
 0x1a0   : > { %s905_s17 = smov %s787_s26  ;;  %s906_s18 = smov %s706_s19 }
 0x1a1   : > { %s907_s19 = smov %s909_s22  ;;  %17 = sbr.rel (!%p15_p0) target bundleno = 4 (0x4), region = 84 }
 0x1a6   :  { %466 = vsyncpa [#allocation3], 1 }
 0x1a7   :  { %468 = vsyncpa [#allocation3 + $0x1], 1 }

// kernel: _pipeline.5
= control target key start
LH: loop header
LB: loop body
LE: loop exit
PB: predicated region body
PF: predicated region fallthrough
CT: control target
= control target key end

     0   :  { %s628_s15 = smov 0   ;;  %s828_s0 = inlined_call_operand.vmem [shape: f32[2,8,256], index: 0, kind: input, shape index: {}]   ;;  %s829_s1 = inlined_call_operand.vmem [shape: f32[8,3], index: 1, kind: input, shape index: {}]   ;;  %s830_s2 = inlined_call_operand.vmem [shape: f32[9,8,256], index: 2, kind: input, shape index: {}]   ;;  %s831_s3 = inlined_call_operand.vmem [shape: f32[2,8,256], index: 3, kind: output, shape index: {0}]   ;;  %s832_s4 = inlined_call_operand.vmem [shape: f32[2,8,2], index: 4, kind: output, shape index: {1}]  }
   0x1 LB: > { %s529_s16 = sadd.s32 4294967295, %s589_s15   ;;  %p533_p0 = scmp.ge.s32.totalorder %s589_s15, 1  ;;  %s589_s15 = sphi %s628_s15, %s15_s15  }
   0x2   : > { %p165_p1 = scmp.lt.s32.totalorder %s589_s15, 3 }
   0x4   : > { %p166_p2 = pnand %p533_p0, %p165_p1 }
   0x5   : > { %p195_p3 = scmp.lt.s32.totalorder (!%p166_p2), %s529_s16, 1  ;;  %s593_s23 = smov (!%p166_p2), 1  }
   0x6   : > { %169 = sbr.rel (%p166_p2) target bundleno = 536 (0x218), region = 32  ;;  %s594_s24 = smov (!%p166_p2), 16  }
   0x7   : > { %s595_s25 = smov (!%p166_p2), 17   ;;  %s596_s26 = smov (!%p166_p2), 127  }
   0x8   : > { %s598_s27 = smov (!%p166_p2), 112   ;;  %s599_s28 = smov (!%p166_p2), 15  }
   0x9   : > { %s600_s29 = smov (!%p166_p2), 111   ;;  %s601_s30 = smov (!%p166_p2), 113  }
   0xb   : > { %v209_v0 = vld [vmem:[%s829_s1] sm:$0xff]  ;;  %v591_v1 = vmov 0   ;;  %v592_v2 = vmov 1   ;;  %s834_s16 = smov (!%p195_p3, %s529_s16), 1  ;;  %v597_v13 = vmov 2   ;;  %v602_v14 = vmov 1.0  }
   0xc   : > { %579 = vset.pattern.permute.xlu0 %v591_v1  ;;  %s557_s19 = sshll.u32 %s834_s16, 4  ;;  %581 = vset.pattern.permute.xlu1 %v597_v13  ;;  %v238_v21 = vlaneseq  ;;  %v232_v26 = vld [vmem:[%s830_s2] sm:$0xff]  ;;  %v233_v27 = vld [vmem:[%s830_s2 + $0x8] sm:$0xff]  ;;  %v541_v35 = vld [vmem:[%s830_s2 + $0x10] sm:$0xff]  ;;  %vm439_vm8 = vcmask 7168   ;;  %vm441_vm9 = vcmask 15360  }
   0xd   : > { %214 = vperm.xlu0 %579, %v209_v0   ;;  %s199_s22 = scalar_lea.vmem %s828_s0, %s557_s19  ;;  %353 = vmatpush.msra.mxu0 %v602_v14  ;;  %v539_v30 = vld [vmem:[%s830_s2 + $0x40] sm:$0xff]  ;;  %v540_v31 = vld [vmem:[%s830_s2 + $0x48] sm:$0xff]  ;;  %v542_v38 = vld [vmem:[%s830_s2 + $0x18] sm:$0xff] }
   0xe   : > { %v210_v4 = vld [vmem:[%s199_s22] sm:$0xff]  ;;  %v211_v8 = vld [vmem:[%s199_s22 + $0x8] sm:$0xff]  ;;  %373 = vmatpush.msra.mxu1 %v602_v14  ;;  %395 = vmatpush.msra.mxu2 %v602_v14  ;;  %v728_v22 = vand.u32 127, %v238_v21  ;;  %v545_v48 = vld [vmem:[%s830_s2 + $0x30] sm:$0xff] }
   0xf   : > { %415 = vmatpush.msra.mxu3 %v602_v14  ;;  %354 = vmatpush.msra.mxu0 %v602_v14  ;;  %v543_v41 = vld [vmem:[%s830_s2 + $0x20] sm:$0xff]  ;;  %v544_v42 = vld [vmem:[%s830_s2 + $0x28] sm:$0xff]  ;;  %v546_v49 = vld [vmem:[%s830_s2 + $0x38] sm:$0xff] }
  0x10   : > { %374 = vmatpush.msra.mxu1 %v602_v14  ;;  %396 = vmatpush.msra.mxu2 %v602_v14  ;;  %vm240_vm0 = vcmp.lt.s32.totalorder %v728_v22, 17  ;;  %vm254_vm1 = vcmp.lt.s32.totalorder %v728_v22, 16  ;;  %vm268_vm2 = vcmp.lt.s32.totalorder %v728_v22, 15  ;;  %vm282_vm3 = vcmp.lt.s32.totalorder %v728_v22, 1  ;;  %v547_v62 = vld [vmem:[%s830_s2 + $0x50] sm:$0xff]  ;;  %v548_v1 = vld [vmem:[%s830_s2 + $0x58] sm:$0xff] }
  0x11   : > { %416 = vmatpush.msra.mxu3 %v602_v14  ;;  %355 = vmatpush.msra.mxu0 %v602_v14  ;;  %vm296_vm4 = vcmp.lt.s32.totalorder %v728_v22, 127  ;;  %vm310_vm5 = vcmp.lt.s32.totalorder %v728_v22, 113  ;;  %vm338_vm6 = vcmp.lt.s32.totalorder %v728_v22, 111  ;;  %vm324_vm7 = vcmp.lt.s32.totalorder %v728_v22, 112  ;;  %v553_v21 = vld [vmem:[%s830_s2 + $0x80] sm:$0xff] }
  0x12   : > { %375 = vmatpush.msra.mxu1 %v602_v14  ;;  %397 = vmatpush.msra.mxu2 %v602_v14 }
  0x13   : > { %417 = vmatpush.msra.mxu3 %v602_v14  ;;  %356 = vmatpush.msra.mxu0 %v602_v14 }
  0x14   : > { %376 = vmatpush.msra.mxu1 %v602_v14  ;;  %398 = vmatpush.msra.mxu2 %v602_v14 }
  0x15   : > { %580 = vset.pattern.permute.xlu0 %v592_v2  ;;  %418 = vmatpush.msra.mxu3 %v602_v14 }
  0x16   : > { %220 = vperm.xlu0 %580, %v209_v0   ;;  %357 = vmatpush.msra.mxu0 %v602_v14 }
  0x17   : > { %377 = vmatpush.msra.mxu1 %v602_v14  ;;  %399 = vmatpush.msra.mxu2 %v602_v14 }
  0x18   : > { %419 = vmatpush.msra.mxu3 %v602_v14  ;;  %358 = vmatpush.msra.mxu0 %v602_v14 }
  0x19   : > { %378 = vmatpush.msra.mxu1 %v602_v14  ;;  %400 = vmatpush.msra.mxu2 %v602_v14 }
  0x1a   : > { %420 = vmatpush.msra.mxu3 %v602_v14  ;;  %359 = vmatpush.msra.mxu0 %v602_v14 }
  0x1b   : > { %379 = vmatpush.msra.mxu1 %v602_v14  ;;  %401 = vmatpush.msra.mxu2 %v602_v14 }
  0x1c   : > { %421 = vmatpush.msra.mxu3 %v602_v14  ;;  %360 = vmatpush.msra.mxu0 %v602_v14 }
  0x1d   : > { %380 = vmatpush.msra.mxu1 %v602_v14  ;;  %402 = vmatpush.msra.mxu2 %v602_v14 }
  0x1e   : > { %582 = vset.pattern.permute.xlu0 %v597_v13  ;;  %422 = vmatpush.msra.mxu3 %v602_v14 }
  0x1f   : > { %361 = vmatpush.msra.mxu0 %v602_v14  ;;  %381 = vmatpush.msra.mxu1 %v602_v14 }
  0x20   : > { %403 = vmatpush.msra.mxu2 %v602_v14  ;;  %423 = vmatpush.msra.mxu3 %v602_v14 }
  0x21   : > { %362 = vmatpush.msra.mxu0 %v602_v14  ;;  %382 = vmatpush.msra.mxu1 %v602_v14 }
  0x22   : > { %404 = vmatpush.msra.mxu2 %v602_v14  ;;  %424 = vmatpush.msra.mxu3 %v602_v14 }
  0x23   : > { %363 = vmatpush.msra.mxu0 %v602_v14  ;;  %383 = vmatpush.msra.mxu1 %v602_v14 }
  0x24   : > { %405 = vmatpush.msra.mxu2 %v602_v14  ;;  %425 = vmatpush.msra.mxu3 %v602_v14 }
  0x25   : > { %364 = vmatpush.msra.mxu0 %v602_v14  ;;  %384 = vmatpush.msra.mxu1 %v602_v14 }
  0x26   : > { %406 = vmatpush.msra.mxu2 %v602_v14  ;;  %426 = vmatpush.msra.mxu3 %v602_v14 }
  0x27   : > { %365 = vmatpush.msra.mxu0 %v602_v14  ;;  %385 = vmatpush.msra.mxu1 %v602_v14 }
  0x28   : > { %407 = vmatpush.msra.mxu2 %v602_v14  ;;  %427 = vmatpush.msra.mxu3 %v602_v14 }
  0x29   : > { %366 = vmatpush.msra.mxu0 %v602_v14  ;;  %386 = vmatpush.msra.mxu1 %v602_v14 }
  0x2a   : > { %408 = vmatpush.msra.mxu2 %v602_v14  ;;  %428 = vmatpush.msra.mxu3 %v602_v14 }
  0x2b   : > { %367 = vmatpush.msra.mxu0 %v602_v14  ;;  %387 = vmatpush.msra.mxu1 %v602_v14 }
  0x2c   : > { %409 = vmatpush.msra.mxu2 %v602_v14  ;;  %429 = vmatpush.msra.mxu3 %v602_v14 }
  0x2d   : > { %368 = vmatpush.msra.mxu0 %v602_v14  ;;  %388 = vmatpush.msra.mxu1 %v602_v14 }
  0x2e   : > { %410 = vmatpush.msra.mxu2 %v602_v14  ;;  %430 = vmatpush.msra.mxu3 %v602_v14 }
  0x7f   : > { %v215_v3 = vpop.permute.xlu0 %214 }
  0x80   : > { %v217_v5 = vmul.f32 %v215_v3, %v210_v4  ;;  %v218_v10 = vmul.f32 %v215_v3, %v211_v8  ;;  %v549_v4 = vld [vmem:[%s830_s2 + $0x60] sm:$0xff] }
  0x88   : > { %v221_v6 = vpop.permute.xlu0 %220 }
  0x89   : > { %v223_v7 = vadd.f32 %v221_v6, %v217_v5  ;;  %v224_v11 = vadd.f32 %v221_v6, %v218_v10  ;;  %v550_v5 = vld [vmem:[%s830_s2 + $0x68] sm:$0xff] }
  0x8b   : > { %v647_v9 = vmax.f32 %v223_v7, 0.0  ;;  %v653_v12 = vmax.f32 %v224_v11, 0.0 }
  0x8d   : > { %278 = vrot.lane.b32.xlu0 %v647_v9, %s593_s23  ;;  %250 = vrot.lane.b32.xlu2 %v647_v9, %s594_s24  ;;  %v231_v36 = vmul.f32 %v540_v31, %v653_v12  ;;  %v230_v37 = vmul.f32 %v539_v30, %v647_v9 }
  0x8e   : > { %234 = vrot.lane.b32.xlu1 %v647_v9, %s595_s25 }
  0x95   : > { %294 = vrot.lane.b32.xlu0 %v653_v12, %s596_s26  ;;  %252 = vrot.lane.b32.xlu2 %v653_v12, %s594_s24 }
  0x96   : > { %236 = vrot.lane.b32.xlu1 %v653_v12, %s595_s25  ;;  %s204_s25 = scalar_lea.vmem %s831_s3, %s557_s19  ;;  %s538_s19 = sshll.u32 %s834_s16, 3 }
  0x9d   : > { %320 = vrot.lane.b32.xlu0 %v647_v9, %s598_s27  ;;  %266 = vrot.lane.b32.xlu2 %v653_v12, %s599_s28 }
  0x9e   : > { %264 = vrot.lane.b32.xlu1 %v647_v9, %s599_s28  ;;  %s208_s28 = scalar_lea.vmem %s832_s4, %s538_s19 }
  0xa5   : > { %336 = vrot.lane.b32.xlu0 %v653_v12, %s600_s29  ;;  %292 = vrot.lane.b32.xlu2 %v647_v9, %s596_s26 }
  0xa6   : > { %280 = vrot.lane.b32.xlu1 %v653_v12, %s593_s23 }
  0xad   : > { %308 = vrot.lane.b32.xlu2 %v653_v12, %s601_s30 }
  0xae   : > { %306 = vrot.lane.b32.xlu1 %v647_v9, %s601_s30 }
  0xb5   : > { %334 = vrot.lane.b32.xlu2 %v647_v9, %s600_s29 }
  0xb6   : > { %322 = vrot.lane.b32.xlu1 %v653_v12, %s598_s27 }
  0xbe   : > { %346 = vperm.xlu1 %581, %v209_v0  }
  0xe7   : > { %v673_v15 = vpop.permute.xlu2 %250 }
  0xef   : > { %v695_v16 = vpop.permute.xlu2 %252 }
  0xf0   : > { %v255_v39 = vsel %vm254_vm1, %v673_v15, %v695_v16  ;;  %v256_v40 = vsel %vm254_vm1, %v695_v16, %v673_v15  ;;  %v551_v15 = vld [vmem:[%s830_s2 + $0x70] sm:$0xff]  ;;  %v552_v16 = vld [vmem:[%s830_s2 + $0x78] sm:$0xff] }
  0xf1   : > { %v257_v52 = vmul.f32 %v541_v35, %v256_v40  ;;  %v258_v53 = vmul.f32 %v542_v38, %v255_v39 }
  0xf7   : > { %v267_v20 = vpop.permute.xlu2 %266 }
  0xff   : > { %v279_v18 = vpop.permute.xlu0 %278  ;;  %v293_v25 = vpop.permute.xlu2 %292 }
 0x100   : > { %v235_v17 = vpop.permute.xlu1 %234 }
 0x107   : > { %v295_v24 = vpop.permute.xlu0 %294  ;;  %v309_v54 = vpop.permute.xlu2 %308 }
 0x108   : > { %v237_v19 = vpop.permute.xlu1 %236  ;;  %v297_v2 = vsel %vm296_vm4, %v293_v25, %v295_v24  ;;  %v298_v3 = vsel %vm296_vm4, %v295_v24, %v293_v25 }
 0x109   : > { %v241_v28 = vsel %vm240_vm0, %v235_v17, %v237_v19  ;;  %v242_v29 = vsel %vm240_vm0, %v237_v19, %v235_v17  ;;  %v299_v10 = vmul.f32 %v547_v62, %v297_v2  ;;  %v300_v11 = vmul.f32 %v548_v1, %v298_v3 }
 0x10a   : > { %v243_v32 = vmul.f32 %v242_v29, %v232_v26  ;;  %v244_v33 = vmul.f32 %v241_v28, %v233_v27 }
 0x10c   : > { %v245_v45 = vadd.f32 %v243_v32, %v230_v37  ;;  %v246_v46 = vadd.f32 %v244_v33, %v231_v36 }
 0x10e   : > { %v260_v57 = vadd.f32 %v258_v53, %v246_v46  ;;  %v259_v58 = vadd.f32 %v257_v52, %v245_v45 }
 0x10f   : > { %v321_v47 = vpop.permute.xlu0 %320  ;;  %v335_v17 = vpop.permute.xlu2 %334 }
 0x110   : > { %v265_v23 = vpop.permute.xlu1 %264 }
 0x111   : > { %v269_v43 = vsel %vm268_vm2, %v265_v23, %v267_v20  ;;  %v270_v44 = vsel %vm268_vm2, %v267_v20, %v265_v23  ;;  %v554_v23 = vld [vmem:[%s830_s2 + $0x88] sm:$0xff] }
 0x112   : > { %v271_v55 = vmul.f32 %v543_v41, %v270_v44  ;;  %v272_v56 = vmul.f32 %v544_v42, %v269_v43 }
 0x114   : > { %v273_v63 = vadd.f32 %v271_v55, %v259_v58  ;;  %v274_v0 = vadd.f32 %v272_v56, %v260_v57 }
 0x117   : > { %v337_v12 = vpop.permute.xlu0 %336 }
 0x118   : > { %v281_v34 = vpop.permute.xlu1 %280  ;;  %v339_v24 = vsel %vm338_vm6, %v335_v17, %v337_v12  ;;  %v340_v25 = vsel %vm338_vm6, %v337_v12, %v335_v17 }
 0x119   : > { %v283_v50 = vsel %vm282_vm3, %v279_v18, %v281_v34  ;;  %v284_v51 = vsel %vm282_vm3, %v281_v34, %v279_v18  ;;  %v341_v32 = vmul.f32 %v553_v21, %v339_v24  ;;  %v342_v33 = vmul.f32 %v554_v23, %v340_v25 }
 0x11a   : > { %v285_v59 = vmul.f32 %v545_v48, %v284_v51  ;;  %v286_v60 = vmul.f32 %v546_v49, %v283_v50 }
 0x11c   : > { %v287_v8 = vadd.f32 %v285_v59, %v273_v63  ;;  %v288_v9 = vadd.f32 %v286_v60, %v274_v0 }
 0x11e   : > { %v302_v18 = vadd.f32 %v300_v11, %v288_v9  ;;  %v301_v19 = vadd.f32 %v299_v10, %v287_v8 }
 0x120   : > { %v307_v61 = vpop.permute.xlu1 %306 }
 0x121   : > { %v311_v6 = vsel %vm310_vm5, %v307_v61, %v309_v54  ;;  %v312_v7 = vsel %vm310_vm5, %v309_v54, %v307_v61 }
 0x122   : > { %v313_v13 = vmul.f32 %v549_v4, %v311_v6  ;;  %v314_v14 = vmul.f32 %v550_v5, %v312_v7 }
 0x124   : > { %v315_v28 = vadd.f32 %v313_v13, %v301_v19  ;;  %v316_v29 = vadd.f32 %v314_v14, %v302_v18 }
 0x128   : > { %v323_v20 = vpop.permute.xlu1 %322 }
 0x129   : > { %v325_v26 = vsel %vm324_vm7, %v321_v47, %v323_v20  ;;  %v326_v27 = vsel %vm324_vm7, %v323_v20, %v321_v47 }
 0x12a   : > { %v327_v30 = vmul.f32 %v551_v15, %v325_v26  ;;  %v328_v31 = vmul.f32 %v552_v16, %v326_v27 }
 0x12c   : > { %v330_v34 = vadd.f32 %v328_v31, %v316_v29  ;;  %v329_v35 = vadd.f32 %v327_v30, %v315_v28 }
 0x12e   : > { %v344_v36 = vadd.f32 %v342_v33, %v330_v34  ;;  %v343_v37 = vadd.f32 %v341_v32, %v329_v35 }
 0x130   : > { %v347_v38 = vpop.permute.xlu1 %346 }
 0x131   : > { %v349_v39 = vadd.f32 %v347_v38, %v343_v37  ;;  %v350_v22 = vadd.f32 %v347_v38, %v344_v36 }
 0x133   : > { %351 = vst [vmem:[%s204_s25] sm:$0xff] %v349_v39  ;;  %369 = vmatmul.f32.vlgmr.msra.gmra.mxu0 %v349_v39  ;;  %389 = vmatmul.f32.vlgmr.msra.gmra.mxu1 %v350_v22  ;;  %v393_v40 = vmul.f32 %v349_v39, %v349_v39  ;;  %v394_v41 = vmul.f32 %v350_v22, %v350_v22 }
 0x134   : > { %352 = vst [vmem:[%s204_s25 + $0x8] sm:$0xff] %v350_v22 }
 0x135   : > { %411 = vmatmul.f32.vlgmr.msra.gmra.mxu2 %v393_v40  ;;  %431 = vmatmul.f32.vlgmr.msra.gmra.mxu3 %v394_v41 }
 0x1b0   : > { %v370_v45 = vpop.f32.mrf.mxu0  ;;  %v390_v46 = vpop.f32.mrf.mxu1 }
 0x1b1   : > { %v391_v47 = vadd.f32 %v390_v46, %v370_v45 }
 0x1b8   : > { %v412_v42 = vpop.f32.mrf.mxu2  ;;  %v432_v43 = vpop.f32.mrf.mxu3 }
 0x1b9   : > { %v433_v44 = vadd.f32 %v432_v43, %v412_v42 }
 0x1bb   : > { %436 = vrot.lane.b32.xlu2 %v433_v44, %s593_s23 }
 0x215   : > { %v437_v48 = vpop.permute.xlu2 %436 }
 0x216   : > { %v440_v49 = vsel %vm439_vm8, %v391_v47, %v437_v48 }
 0x217   : > { %442 = vst.msk [vmem:[%s208_s28] sm:$0xff] %vm441_vm9, %v440_v49 }
 0x218 PF: > { %s15_s15 = sadd.s32 1, %s589_s15  }
 0x219   : > { %p12_p4 = scmp.ge.s32.totalorder %s15_s15, 4  }
 0x21b   :  { %14 = sbr.rel (!%p12_p4) target bundleno = 1 (0x1), region = 82 }

// kernel: _pipeline.6
= control target key start
LH: loop header
LB: loop body
LE: loop exit
PB: predicated region body
PF: predicated region fallthrough
CT: control target
= control target key end

     0   :  { %s607_s12 = smov 0   ;;  %s609_s13 = smov 0   ;;  %s732_s0 = inlined_call_operand.vmem [shape: f32[2,8,256], index: 0, kind: input, shape index: {}]   ;;  %s733_s1 = inlined_call_operand.vmem [shape: f32[24,8], index: 1, kind: input, shape index: {}]   ;;  %s734_s2 = inlined_call_operand.vmem [shape: f32[24,1], index: 2, kind: input, shape index: {}]   ;;  %s735_s3 = inlined_call_operand.vmem [shape: f32[2,1,24,2], index: 3, kind: output, shape index: {}]  }
   0x1   :  { %s611_s14 = smov 0  }
   0x2 LB: > { %s25_s15 = sadd.s32 1, %s578_s13  ;;  %p517_p0 = scmp.ge.s32.totalorder %s582_s14, 1  ;;  %s582_s14 = sphi %s611_s14, %s13_s14   ;;  %s578_s13 = sphi %s609_s13, %s737_s13   ;;  %s574_s12 = sphi %s607_s12, %s736_s12  }
   0x3   : > { %p27_p1 = scmp.ge.s32.totalorder %s25_s15, 2  ;;  %p158_p2 = scmp.lt.s32.totalorder %s582_s14, 3 }
   0x5   : > { %s739_s15 = smov (%p27_p1, %s25_s15), 0  ;;  %p159_p3 = pnand %p517_p0, %p158_p2 }
   0x6   : > { %p191_p4 = scmp.lt.s32.totalorder (!%p159_p3), %s574_s12, 1  ;;  %s586_s5 = smov (!%p159_p3), 1  }
   0x7   : > { %162 = sbr.rel (%p159_p3) target bundleno = 393 (0x189), region = 32 }
   0xc   : > { %v214_v0 = vld [vmem:[%s734_s2] sm:$0xff]  ;;  %v584_v1 = vmov 0   ;;  %v216_v2 = vld [vmem:[%s734_s2 + $0x10] sm:$0xff]  ;;  %s741_s12 = smov (!%p191_p4, %s574_s12), 1  ;;  %v585_v3 = vmov 1.0   ;;  %vm232_vm0 = vcmask 64512  }
   0xd   : > { %558 = vset.pattern.permute.xlu0 %v584_v1  ;;  %559 = vset.pattern.permute.xlu1 %v584_v1  ;;  %s529_s20 = sshll.u32 %s741_s12, 4  ;;  %v211_v4 = vld [vmem:[%s733_s1] sm:$0xff]  ;;  %v215_v7 = vld [vmem:[%s734_s2 + $0x8] sm:$0xff]  ;;  %v213_v9 = vld [vmem:[%s733_s1 + $0x10] sm:$0xff]  ;;  %s530_s6 = smul.u32 24, %s741_s12  ;;  %vm416_vm1 = vcmask 7168  }
   0xe   : > { %219 = vperm.xlu0 %558, %v214_v0   ;;  %229 = vperm.xlu1 %559, %v216_v2   ;;  %s198_s23 = scalar_lea.vmem %s732_s0, %s529_s20  ;;  %v212_v8 = vld [vmem:[%s733_s1 + $0x8] sm:$0xff]  ;;  %vm420_vm2 = vcmask 15360  }
   0xf   : > { %294 = vmatpush.msra.mxu2 %v585_v3  ;;  %320 = vmatpush.msra.mxu3 %v585_v3  ;;  %v209_v5 = vld [vmem:[%s198_s23] sm:$0xff]  ;;  %v210_v6 = vld [vmem:[%s198_s23 + $0x8] sm:$0xff]  ;;  %s208_s9 = scalar_lea.vmem %s735_s3, %s530_s6 }
  0x10   : > { %257 = vmatpush.msra.mxu0 %v209_v5  ;;  %283 = vmatpush.msra.mxu1 %v210_v6 }
  0x11   : > { %295 = vmatpush.msra.mxu2 %v585_v3  ;;  %321 = vmatpush.msra.mxu3 %v585_v3 }
  0x12   : > { %521 = vmatmul.msk.f32.vlgmr.msra.gmra.mxu0 %vm232_vm0, %v211_v4  ;;  %524 = vmatmul.msk.f32.vlgmr.msra.gmra.mxu1 %vm232_vm0, %v211_v4 }
  0x13   : > { %352 = vmatpush.msrb.mxu0 %v585_v3  ;;  %378 = vmatpush.msrb.mxu1 %v585_v3 }
  0x14   : > { %296 = vmatpush.msra.mxu2 %v585_v3  ;;  %322 = vmatpush.msra.mxu3 %v585_v3 }
  0x15   : > { %353 = vmatpush.msrb.mxu0 %v585_v3  ;;  %379 = vmatpush.msrb.mxu1 %v585_v3 }
  0x16   : > { %224 = vperm.xlu0 %558, %v215_v7   ;;  %297 = vmatpush.msra.mxu2 %v585_v3 }
  0x17   : > { %323 = vmatpush.msra.mxu3 %v585_v3  ;;  %354 = vmatpush.msrb.mxu0 %v585_v3 }
  0x18   : > { %380 = vmatpush.msrb.mxu1 %v585_v3  ;;  %298 = vmatpush.msra.mxu2 %v585_v3 }
  0x19   : > { %324 = vmatpush.msra.mxu3 %v585_v3  ;;  %355 = vmatpush.msrb.mxu0 %v585_v3 }
  0x1a   : > { %522 = vmatmul.msk.f32.gmra.mxu0 %vm232_vm0, %v212_v8  ;;  %525 = vmatmul.msk.f32.gmra.mxu1 %vm232_vm0, %v212_v8 }
  0x1b   : > { %381 = vmatpush.msrb.mxu1 %v585_v3  ;;  %299 = vmatpush.msra.mxu2 %v585_v3 }
  0x1c   : > { %325 = vmatpush.msra.mxu3 %v585_v3  ;;  %356 = vmatpush.msrb.mxu0 %v585_v3 }
  0x1d   : > { %382 = vmatpush.msrb.mxu1 %v585_v3  ;;  %300 = vmatpush.msra.mxu2 %v585_v3 }
  0x1e   : > { %326 = vmatpush.msra.mxu3 %v585_v3  ;;  %357 = vmatpush.msrb.mxu0 %v585_v3 }
  0x1f   : > { %383 = vmatpush.msrb.mxu1 %v585_v3  ;;  %301 = vmatpush.msra.mxu2 %v585_v3 }
  0x20   : > { %327 = vmatpush.msra.mxu3 %v585_v3  ;;  %358 = vmatpush.msrb.mxu0 %v585_v3 }
  0x21   : > { %384 = vmatpush.msrb.mxu1 %v585_v3  ;;  %302 = vmatpush.msra.mxu2 %v585_v3 }
  0x22   : > { %523 = vmatmul.msk.f32.gmra.mxu0 %vm232_vm0, %v213_v9  ;;  %526 = vmatmul.msk.f32.gmra.mxu1 %vm232_vm0, %v213_v9 }
  0x23   : > { %328 = vmatpush.msra.mxu3 %v585_v3  ;;  %359 = vmatpush.msrb.mxu0 %v585_v3 }
  0x24   : > { %385 = vmatpush.msrb.mxu1 %v585_v3  ;;  %303 = vmatpush.msra.mxu2 %v585_v3 }
  0x25   : > { %329 = vmatpush.msra.mxu3 %v585_v3  ;;  %360 = vmatpush.msrb.mxu0 %v585_v3 }
  0x26   : > { %386 = vmatpush.msrb.mxu1 %v585_v3  ;;  %304 = vmatpush.msra.mxu2 %v585_v3 }
  0x27   : > { %330 = vmatpush.msra.mxu3 %v585_v3  ;;  %361 = vmatpush.msrb.mxu0 %v585_v3 }
  0x28   : > { %387 = vmatpush.msrb.mxu1 %v585_v3  ;;  %305 = vmatpush.msra.mxu2 %v585_v3 }
  0x29   : > { %331 = vmatpush.msra.mxu3 %v585_v3  ;;  %362 = vmatpush.msrb.mxu0 %v585_v3 }
  0x2a   : > { %388 = vmatpush.msrb.mxu1 %v585_v3  ;;  %306 = vmatpush.msra.mxu2 %v585_v3 }
  0x2b   : > { %332 = vmatpush.msra.mxu3 %v585_v3  ;;  %363 = vmatpush.msrb.mxu0 %v585_v3 }
  0x2c   : > { %389 = vmatpush.msrb.mxu1 %v585_v3  ;;  %307 = vmatpush.msra.mxu2 %v585_v3 }
  0x2d   : > { %333 = vmatpush.msra.mxu3 %v585_v3  ;;  %364 = vmatpush.msrb.mxu0 %v585_v3 }
  0x2e   : > { %390 = vmatpush.msrb.mxu1 %v585_v3  ;;  %308 = vmatpush.msra.mxu2 %v585_v3 }
  0x2f   : > { %334 = vmatpush.msra.mxu3 %v585_v3  ;;  %365 = vmatpush.msrb.mxu0 %v585_v3 }
  0x30   : > { %391 = vmatpush.msrb.mxu1 %v585_v3  ;;  %309 = vmatpush.msra.mxu2 %v585_v3 }
  0x31   : > { %335 = vmatpush.msra.mxu3 %v585_v3  ;;  %366 = vmatpush.msrb.mxu0 %v585_v3 }
  0x32   : > { %392 = vmatpush.msrb.mxu1 %v585_v3 }
  0x33   : > { %367 = vmatpush.msrb.mxu0 %v585_v3 }
  0x34   : > { %393 = vmatpush.msrb.mxu1 %v585_v3 }
  0x80   : > { %v220_v10 = vpop.permute.xlu0 %219  ;;  %v230_v24 = vpop.permute.xlu1 %229 }
  0x88   : > { %v225_v17 = vpop.permute.xlu0 %224 }
  0x8f   : > { %v259_v11 = vpop.f32.mrf.mxu0  ;;  %v285_v12 = vpop.f32.mrf.mxu1 }
  0x90   : > { %v260_v13 = vadd.f32 %v259_v11, %v220_v10  ;;  %v286_v14 = vadd.f32 %v285_v12, %v220_v10 }
  0x92   : > { %v346_v15 = vmul.f32 %v260_v13, %v260_v13  ;;  %v347_v16 = vmul.f32 %v286_v14, %v286_v14  ;;  %310 = vmatmul.f32.vlgmr.msra.gmra.mxu2 %v260_v13  ;;  %336 = vmatmul.f32.vlgmr.msra.gmra.mxu3 %v286_v14 }
  0x94   : > { %368 = vmatmul.f32.vlgmr.msrb.gmra.mxu0 %v346_v15  ;;  %394 = vmatmul.f32.vlgmr.msrb.gmra.mxu1 %v347_v16 }
  0x97   : > { %v262_v18 = vpop.f32.mrf.mxu0  ;;  %v288_v19 = vpop.f32.mrf.mxu1 }
  0x98   : > { %v263_v20 = vadd.f32 %v262_v18, %v225_v17  ;;  %v289_v21 = vadd.f32 %v288_v19, %v225_v17 }
  0x9a   : > { %313 = vmatmul.f32.gmra.mxu2 %v263_v20  ;;  %339 = vmatmul.f32.gmra.mxu3 %v289_v21  ;;  %v348_v22 = vmul.f32 %v263_v20, %v263_v20  ;;  %v349_v23 = vmul.f32 %v289_v21, %v289_v21 }
  0x9c   : > { %371 = vmatmul.f32.gmra.mxu0 %v348_v22  ;;  %397 = vmatmul.f32.gmra.mxu1 %v349_v23 }
  0x9f   : > { %v265_v25 = vpop.f32.mrf.mxu0  ;;  %v291_v26 = vpop.f32.mrf.mxu1 }
  0xa0   : > { %v266_v27 = vadd.f32 %v265_v25, %v230_v24  ;;  %v292_v28 = vadd.f32 %v291_v26, %v230_v24 }
  0xa2   : > { %v350_v29 = vmul.f32 %v266_v27, %v266_v27  ;;  %v351_v30 = vmul.f32 %v292_v28, %v292_v28  ;;  %316 = vmatmul.f32.gmra.mxu2 %v266_v27  ;;  %342 = vmatmul.f32.gmra.mxu3 %v292_v28 }
  0xa4   : > { %374 = vmatmul.f32.gmra.mxu0 %v350_v29  ;;  %400 = vmatmul.f32.gmra.mxu1 %v351_v30 }
 0x111   : > { %v369_v31 = vpop.f32.mrf.mxu0  ;;  %v395_v32 = vpop.f32.mrf.mxu1 }
 0x112   : > { %v396_v33 = vadd.f32 %v395_v32, %v369_v31 }
 0x114   : > { %407 = vrot.lane.b32.xlu1 %v396_v33, %s586_s5 }
 0x115   : > { %v311_v40 = vpop.f32.mrf.mxu2  ;;  %v337_v41 = vpop.f32.mrf.mxu3 }
 0x116   : > { %v338_v52 = vadd.f32 %v337_v41, %v311_v40 }
 0x119   : > { %v372_v34 = vpop.f32.mrf.mxu0  ;;  %v398_v35 = vpop.f32.mrf.mxu1 }
 0x11a   : > { %v399_v36 = vadd.f32 %v398_v35, %v372_v34 }
 0x11c   : > { %409 = vrot.lane.b32.xlu2 %v399_v36, %s586_s5 }
 0x11d   : > { %v314_v42 = vpop.f32.mrf.mxu2  ;;  %v340_v43 = vpop.f32.mrf.mxu3 }
 0x11e   : > { %v341_v44 = vadd.f32 %v340_v43, %v314_v42 }
 0x121   : > { %v375_v37 = vpop.f32.mrf.mxu0  ;;  %v401_v38 = vpop.f32.mrf.mxu1 }
 0x122   : > { %v402_v39 = vadd.f32 %v401_v38, %v375_v37 }
 0x124   : > { %411 = vrot.lane.b32.xlu2 %v402_v39, %s586_s5 }
 0x125   : > { %v317_v47 = vpop.f32.mrf.mxu2  ;;  %v343_v48 = vpop.f32.mrf.mxu3 }
 0x126   : > { %v344_v49 = vadd.f32 %v343_v48, %v317_v47 }
 0x176   : > { %v410_v45 = vpop.permute.xlu2 %409 }
 0x177   : > { %v418_v46 = vsel %vm416_vm1, %v341_v44, %v410_v45 }
 0x178   : > { %422 = vst.msk [vmem:[%s208_s9 + $0x8] sm:$0xff] %vm420_vm2, %v418_v46 }
 0x17e   : > { %v412_v50 = vpop.permute.xlu2 %411 }
 0x17f   : > { %v419_v51 = vsel %vm416_vm1, %v344_v49, %v412_v50 }
 0x180   : > { %423 = vst.msk [vmem:[%s208_s9 + $0x10] sm:$0xff] %vm420_vm2, %v419_v51 }
 0x186   : > { %v408_v53 = vpop.permute.xlu1 %407 }
 0x187   : > { %v417_v54 = vsel %vm416_vm1, %v338_v52, %v408_v53 }
 0x188   : > { %421 = vst.msk [vmem:[%s208_s9] sm:$0xff] %vm420_vm2, %v417_v54 }
 0x189 PF: > { %s13_s14 = sadd.s32 1, %s582_s14   ;;  %s736_s12 = smov %s578_s13 }
 0x18a   : > { %p10_p5 = scmp.ge.s32.totalorder %s13_s14, 4   ;;  %s737_s13 = smov %s739_s15 }
 0x18c   :  { %12 = sbr.rel (!%p10_p5) target bundleno = 2 (0x2), region = 62 }

// kernel: _pipeline.7
= control target key start
LH: loop header
LB: loop body
LE: loop exit
PB: predicated region body
PF: predicated region fallthrough
CT: control target
= control target key end

     0   :  { %9 = vsyncpa [#allocation3], 0  ;;  %s814_s0 = inlined_call_operand.vmem [shape: f32[2,8,256], index: 0, kind: input, shape index: {}]   ;;  %s815_s1 = inlined_call_operand.vmem [shape: f32[2,24,256], index: 1, kind: input, shape index: {}]   ;;  %s816_s2 = inlined_call_operand.vmem [shape: f32[24,8], index: 2, kind: input, shape index: {}]   ;;  %s817_s3 = inlined_call_operand.vmem [shape: f32[24,1], index: 3, kind: input, shape index: {}]   ;;  %s818_s4 = inlined_call_operand.hbm [shape: f32[2,24,256], index: 4, kind: output, shape index: {}]  }
   0x1   :  { %11 = vsyncpa [#allocation3 + $0x1], 0  ;;  %s678_s15 = smov 0   ;;  %s680_s16 = smov 0  }
   0x2   :  { %s682_s17 = smov 0   ;;  %s684_s18 = smov 0  }
   0x3   :  { %s686_s19 = smov 0   ;;  %s688_s20 = smov 0  }
   0x4 LB: > { %s487_s21 = sadd.s32 4294967295, %s648_s20   ;;  %s488_s22 = sadd.s32 4294967294, %s648_s20   ;;  %s648_s20 = sphi %s688_s20, %s17_s20   ;;  %s644_s19 = sphi %s686_s19, %s825_s19   ;;  %s640_s18 = sphi %s684_s18, %s824_s18   ;;  %s636_s17 = sphi %s682_s17, %s823_s17   ;;  %s632_s16 = sphi %s680_s16, %s822_s16   ;;  %s628_s15 = sphi %s678_s15, %s821_s15  }
   0x5   : > { %s29_s23 = sadd.s32 1, %s644_s19  ;;  %s136_s24 = sadd.s32 1, %s636_s17 }
   0x6   : > { %p31_p0 = scmp.ge.s32.totalorder %s29_s23, 2  ;;  %p146_p1 = scmp.ne.s32.totalorder %s636_s17, %s632_s16 }
   0x7   : > { %p147_p2 = scmp.eq.s32.totalorder %s487_s21, 1  ;;  %p152_p3 = scmp.ne.s32.totalorder %s632_s16, %s628_s15 }
   0x8   : > { %s827_s23 = smov (%p31_p0, %s29_s23), 0  ;;  %p153_p5 = scmp.eq.s32.totalorder %s488_s22, 1 }
   0x9   : > { %p718_p4 = por %p147_p2, %p146_p1  ;;  %s131_s26 = ssub.s32 %s644_s19, %s827_s23 }
   0xa   : > { %p491_p6 = scmp.ge.s32.totalorder %s648_s20, 1  ;;  %p134_p7 = scmp.eq.s32.totalorder %s131_s26, 0 }
   0xb   : > { %p725_p8 = por %p153_p5, %p152_p3  ;;  %p203_p9 = scmp.lt.s32.totalorder %s648_s20, 3 }
   0xc   : > { %s731_s28 = scalar_select %p134_p7, %s636_s17, %s136_s24  }
   0xd   : > { %p204_p10 = pnand %p491_p6, %p203_p9 }
   0xe   : > { %p243_p11 = scmp.lt.s32.totalorder (!%p204_p10), %s640_s18, 1  ;;  %s239_s9 = sand.u32 (!%p204_p10), 1, %s632_s16  }
   0xf   : > { %207 = sbr.rel (%p204_p10) target bundleno = 177 (0xb1), region = 36  ;;  %s373_s22 = scalar_lea.sflag (!%p204_p10), [#allocation3], %s239_s9 }
  0x10   : > { %s507_s10 = smul.u32 (!%p204_p10), 48, %s239_s9  ;;  %s590_s5 = scalar_lea.hbm (!%p204_p10), %s818_s4, 96 }
  0x14   : > { %v650_v0 = vmov 0   ;;  %v268_v1 = vld [vmem:[%s817_s3] sm:$0xff]  ;;  %v270_v2 = vld [vmem:[%s817_s3 + $0x10] sm:$0xff]  ;;  %s244_s7 = scalar_select %p243_p11, %s640_s18, 1  ;;  %v266_v3 = vld [vmem:[%s816_s2 + $0x8] sm:$0xff]  ;;  %vm286_vm0 = vcmask 64512  }
  0x15   : > { %568 = vset.pattern.permute.xlu0 %v650_v0  ;;  %569 = vset.pattern.permute.xlu1 %v650_v0  ;;  %v265_v6 = vld [vmem:[%s816_s2] sm:$0xff]  ;;  %v269_v7 = vld [vmem:[%s817_s3 + $0x8] sm:$0xff]  ;;  %v267_v8 = vld [vmem:[%s816_s2 + $0x10] sm:$0xff] }
  0x16   : > { %273 = vperm.xlu0 %568, %v268_v1   ;;  %283 = vperm.xlu1 %569, %v270_v2   ;;  %s504_s8 = sshll.u32 %s244_s7, 4  ;;  %s508_s30 = smul.u32 48, %s244_s7 }
  0x17   : > { %s250_s11 = scalar_lea.vmem %s814_s0, %s504_s8  ;;  %s241_s7 = scalar_lea.vmem [#allocation2], %s507_s10 }
  0x18   : > { %v263_v4 = vld [vmem:[%s250_s11] sm:$0xff]  ;;  %v264_v5 = vld [vmem:[%s250_s11 + $0x8] sm:$0xff]  ;;  %s765_s8 = scalar_lea.vmem %s815_s1, %s508_s30  ;;  %s509_s11 = smul.u32 48, %s640_s18 }
  0x19   : > { %505 = vmatpush.msra.mxu2 %v263_v4  ;;  %506 = vmatpush.msra.mxu3 %v264_v5  ;;  %v348_v11 = vld [vmem:[%s765_s8] sm:$0xff]  ;;  %v349_v13 = vld [vmem:[%s765_s8 + $0x8] sm:$0xff]  ;;  %v350_v20 = vld [vmem:[%s765_s8 + $0x10] sm:$0xff]  ;;  %s387_s21 = sshll.u32 %s241_s7, 4  ;;  %s388_s21 = int_to_ptr.vmem [resolvable:$true] %s387_s21 }
  0x1a   : > { %496 = vmatmul.msk.f32.vlgmr.msra.gmra.mxu2 %vm286_vm0, %v266_v3  ;;  %499 = vmatmul.msk.f32.vlgmr.msra.gmra.mxu3 %vm286_vm0, %v266_v3  ;;  %v351_v22 = vld [vmem:[%s765_s8 + $0x18] sm:$0xff]  ;;  %s386_s14 = scalar_lea.hbm %s818_s4, %s509_s11  ;;  %v352_v33 = vld [vmem:[%s765_s8 + $0x20] sm:$0xff]  ;;  %v353_v35 = vld [vmem:[%s765_s8 + $0x28] sm:$0xff] }
  0x1b   : > { %311 = vmatpush.msra.mxu0 %v263_v4  ;;  %337 = vmatpush.msra.mxu1 %v264_v5  ;;  %s389_s18 = sshll.u32 %s386_s14, 4  ;;  %s390_s18 = int_to_ptr.hbm [resolvable:$true] %s389_s18 }
  0x1c   : > { %495 = vmatmul.msk.f32.vlgmr.msra.gmra.mxu0 %vm286_vm0, %v265_v6  ;;  %498 = vmatmul.msk.f32.vlgmr.msra.gmra.mxu1 %vm286_vm0, %v265_v6  ;;  %s584_s24 = sshra.s32 %s390_s18, 4  ;;  %s585_s24 = int_to_ptr.hbm [resolvable:$true] %s584_s24 }
  0x1d   : > { %s586_s26 = scalar_lea.hbm %s585_s24, 48  ;;  %p591_p1 = scmp.lt.s32.totalorder %s585_s24, %s818_s4 }
  0x1e   : > { %278 = vperm.xlu0 %568, %v269_v7   ;;  %p587_p12 = scmp.ne.s32.totalorder %s585_s24, %s586_s26  ;;  %p592_p2 = scmp.lt.s32.totalorder %s590_s5, %s586_s26 }
  0x20   : > { %p588_p13 = pnand %p587_p12, %p718_p4  ;;  %p593_p3 = por %p592_p2, %p591_p1 }
  0x22   : > { %497 = vmatmul.msk.f32.gmra.mxu2 %vm286_vm0, %v267_v8  ;;  %500 = vmatmul.msk.f32.gmra.mxu3 %vm286_vm0, %v267_v8  ;;  %p589_p0 = pneg %p588_p13 }
  0x24   : > { %p594_p5 = pnand %p593_p3, %p589_p0 }
  0x88   : > { %v274_v9 = vpop.permute.xlu0 %273  ;;  %v284_v31 = vpop.permute.xlu1 %283 }
  0x90   : > { %v279_v16 = vpop.permute.xlu0 %278 }
  0x99   : > { %v313_v10 = vpop.f32.mrf.mxu0  ;;  %v339_v12 = vpop.f32.mrf.mxu1 }
  0x9a   : > { %v314_v14 = vadd.f32 %v313_v10, %v274_v9  ;;  %v340_v15 = vadd.f32 %v339_v12, %v274_v9 }
  0x9c   : > { %v354_v17 = vadd.f32 %v348_v11, %v314_v14  ;;  %v355_v18 = vadd.f32 %v349_v13, %v340_v15 }
  0x9d   : > { %v316_v19 = vpop.f32.mrf.mxu2  ;;  %v342_v21 = vpop.f32.mrf.mxu3 }
  0x9e   : > { %v360_v23 = vmax.f32 %v354_v17, 0.0  ;;  %v317_v24 = vadd.f32 %v316_v19, %v279_v16  ;;  %v361_v25 = vmax.f32 %v355_v18, 0.0  ;;  %v343_v26 = vadd.f32 %v342_v21, %v279_v16 }
  0xa0   : > { %366 = vst [vmem:[%s241_s7] sm:$0xff] %v360_v23  ;;  %v356_v27 = vadd.f32 %v350_v20, %v317_v24  ;;  %v357_v28 = vadd.f32 %v351_v22, %v343_v26 }
  0xa1   : > { %367 = vst [vmem:[%s241_s7 + $0x8] sm:$0xff] %v361_v25 }
  0xa2   : > { %v362_v29 = vmax.f32 %v356_v27, 0.0  ;;  %v363_v30 = vmax.f32 %v357_v28, 0.0 }
  0xa4   : > { %368 = vst [vmem:[%s241_s7 + $0x10] sm:$0xff] %v362_v29 }
  0xa5   : > { %369 = vst [vmem:[%s241_s7 + $0x18] sm:$0xff] %v363_v30  ;;  %v319_v32 = vpop.f32.mrf.mxu2  ;;  %v345_v34 = vpop.f32.mrf.mxu3 }
  0xa6   : > { %v320_v36 = vadd.f32 %v319_v32, %v284_v31  ;;  %v346_v37 = vadd.f32 %v345_v34, %v284_v31 }
  0xa8   : > { %v358_v38 = vadd.f32 %v352_v33, %v320_v36  ;;  %v359_v39 = vadd.f32 %v353_v35, %v346_v37 }
  0xaa   : > { %v364_v40 = vmax.f32 %v358_v38, 0.0  ;;  %v365_v41 = vmax.f32 %v359_v39, 0.0 }
  0xac   : > { %370 = vst [vmem:[%s241_s7 + $0x20] sm:$0xff] %v364_v40 }
  0xad   : > { %371 = vst [vmem:[%s241_s7 + $0x28] sm:$0xff] %v365_v41 }
  0xae   : > { %597 = shalt.err (!%p594_p5)
}
  0xaf   : > { %s651_s9 = smov 256   ;;  %s652_s10 = smov 16  }
  0xb0   : > { %510 = dma.vmem_to_hbm [thread:$0]  (%p718_p4), %s388_s21, 768, %s390_s18, %s373_s22, %s651_s9, %s651_s9, %s652_s10  }
  0xb1 PF: > { %p516_p6 = scmp.ge.s32.totalorder %s648_s20, 2  ;;  %s404_s7 = sand.u32 1, %s628_s15  }
  0xb2   : > { %s405_s11 = scalar_lea.sflag [#allocation3], %s404_s7 }
  0xb3   : > { %p513_p7 = pnand %p516_p6, %p725_p8 }
  0xb5   : > { %p514_p9 = pneg %p513_p7 }
  0xb7   : > { %623 = dma.done.wait (%p514_p9), %s405_s11, 768  }
  0xb8   : > { %625 = vsyncadd (%p514_p9), %s405_s11, 4294966528  ;;  %s17_s20 = sadd.s32 1, %s648_s20   ;;  %s821_s15 = smov %s632_s16 }
  0xb9   : > { %p14_p10 = scmp.ge.s32.totalorder %s17_s20, 4   ;;  %s822_s16 = smov %s636_s17 }
  0xba   : > { %s823_s17 = smov %s731_s28  ;;  %s824_s18 = smov %s644_s19 }
  0xbb   : > { %s825_s19 = smov %s827_s23  ;;  %16 = sbr.rel (!%p14_p10) target bundleno = 4 (0x4), region = 74 }
  0xc0   :  { %411 = vsyncpa [#allocation3], 1 }
  0xc1   :  { %413 = vsyncpa [#allocation3 + $0x1], 1 }

</bundles_post_ra>
